<compile_context>
chip_gen: v6e
topology: v6e:2x2x1
jax: 0.10.0
libtpu: 0.0.40
codegen_flags: <defaults>
</compile_context>

<pallas_src>
import functools

import jax
import jax.numpy as jnp
import numpy as np
from jax import lax
from jax.experimental import pallas as pl
from jax.experimental.pallas import tpu as pltpu

EPS = 1e-5
NEG_SLOPE = 0.01


def _leaky(x):
    return jnp.where(x >= 0, x, NEG_SLOPE * x)


def _round_up(v, m):
    return (v + m - 1) // m * m


def _inorm(x, mask1, inv_n, gamma, beta, *, bblk, lpad):
    """Per-sample instance norm over the folded lane axis.

    x: (C, bblk*lpad) f32; mask1: (1, lpad) valid-pixel mask (identical per sample);
    gamma/beta: (C, 1).  Biased variance over the Ho*Wo valid pixels (InstanceNorm2d).
    """
    outs = []
    for b in range(bblk):
        xb = x[:, b * lpad:(b + 1) * lpad]
        mean = jnp.sum(xb * mask1, axis=1, keepdims=True) * inv_n
        d = xb - mean
        var = jnp.sum(d * d * mask1, axis=1, keepdims=True) * inv_n
        outs.append(d * lax.rsqrt(var + EPS))
    y = outs[0] if bblk == 1 else jnp.concatenate(outs, axis=1)
    return y * gamma + beta


def resblock_kernel(in1_ref, mask_ref,
                    w1_ref, b1_ref, g1_ref, be1_ref,
                    w2_ref, b2_ref, g2_ref, be2_ref,
                    w3_ref, b3_ref, g3_ref, be3_ref,
                    out_ref, buf_ref,
                    *, K, S, Cpad, Wrow, Lpad, Bblk, Ho, Wo, use_conv3):
    """One grid step == Bblk batch samples folded into the lane axis.

    in1_ref : (S*S*Cpad, Wtot)  polyphase zero-padded input, flat row stride Wrow,
              per-sample lane stride Lpad, zero elsewhere.
    mask_ref: (1, Bblk*Lpad)    1.0 at valid output pixels (y<Ho, x<Wo), else 0.
    buf_ref : (Cout, Wbuf)      conv2 staging buffer (fully rewritten every step).
    """
    Cout = out_ref.shape[0]
    Bfold = Bblk * Lpad
    inv_n = 1.0 / float(Ho * Wo)
    p = K // 2

    mask_full = mask_ref[...]                     # (1, Bfold)
    mask1 = mask_full[:, 0:Lpad]                  # (1, Lpad), same for every sample

    # ---- conv1 (KxK, stride S): K*K accumulated MXU matmuls of depth Cpad --------
    # Tap (kh,kw) lives in polyphase plane (kh%S, kw%S) shifted by (kh//S, kw//S),
    # i.e. a single contiguous lane-shifted window of in1 -- no im2col slab needed.
    a1 = jnp.zeros((Cout, Bfold), jnp.float32)
    for kh in range(K):
        for kw in range(K):
            t = kh * K + kw
            pi = (kh % S) * S + (kw % S)
            sh = (kh // S) * Wrow + (kw // S)
            xw = in1_ref[pl.ds(pi * Cpad, Cpad), pl.ds(sh, Bfold)]
            a1 = a1 + jnp.dot(w1_ref[t], xw, preferred_element_type=jnp.float32)
    a1 = a1 + b1_ref[...]
    y1 = _leaky(_inorm(a1, mask1, inv_n, g1_ref[...], be1_ref[...],
                       bblk=Bblk, lpad=Lpad))
    # Zero all pad columns: they are the horizontal/vertical halo of the conv2 input.
    y1 = y1 * mask_full

    # ---- stage y1 into the zero-haloed flat buffer --------------------------------
    # buf holds y1 at offset strip = p*Wrow + p, so conv2 tap (kh,kw) for output
    # column C is buf[C + kh*Wrow + kw].  Head strip, interior and tail strip are all
    # written every step => no stale VMEM, safe under "parallel" grid semantics.
    strip = p * Wrow + p
    Wbuf = buf_ref.shape[1]
    bdt = buf_ref.dtype
    if strip > 0:
        buf_ref[:, pl.ds(0, strip)] = jnp.zeros((Cout, strip), bdt)
    tail = Wbuf - strip - Bfold
    if tail > 0:
        buf_ref[:, pl.ds(strip + Bfold, tail)] = jnp.zeros((Cout, tail), bdt)
    buf_ref[:, pl.ds(strip, Bfold)] = y1.astype(bdt)

    # ---- conv2 (KxK, stride 1): accumulated matmuls on shifted windows of buf -----
    a2 = jnp.zeros((Cout, Bfold), jnp.float32)
    for kh in range(K):
        for kw in range(K):
            t = kh * K + kw
            win = buf_ref[:, pl.ds(kh * Wrow + kw, Bfold)]
            a2 = a2 + jnp.dot(w2_ref[t], win, preferred_element_type=jnp.float32)
    a2 = a2 + b2_ref[...]
    y2 = _inorm(a2, mask1, inv_n, g2_ref[...], be2_ref[...], bblk=Bblk, lpad=Lpad)

    # ---- residual path --------------------------------------------------------------
    pi3 = (p % S) * S + (p % S)
    sh3 = (p // S) * Wrow + (p // S)
    if use_conv3:
        # conv3 (1x1, stride S): exactly the centre polyphase plane -- zero extra reads.
        xc = in1_ref[pl.ds(pi3 * Cpad, Cpad), pl.ds(sh3, Bfold)]
        r = jnp.dot(w3_ref[...], xc, preferred_element_type=jnp.float32) + b3_ref[...]
        r = _inorm(r, mask1, inv_n, g3_ref[...], be3_ref[...], bblk=Bblk, lpad=Lpad)
    else:
        # identity residual (in_ch == out_ch and stride == 1)
        r = in1_ref[pl.ds(0, Cpad), pl.ds(sh3, Bfold)][:Cout].astype(jnp.float32)

    out_ref[...] = _leaky(y2 + r).astype(out_ref.dtype)


def res_block_forward(x_nchw, params, *, stride=2, k=3, bblk=4,
                      matmul_dtype=jnp.float32):
    """Fused ResBlock forward.  Input/output NCHW; params in PyTorch layout
    (OIHW conv weights, 1-D per-channel biases / InstanceNorm affine)."""
    N, Cin, H, W = x_nchw.shape
    K, S, p = k, stride, k // 2
    Cout = params["w1"].shape[0]
    Ho = (H + 2 * p - K) // S + 1
    Wo = (W + 2 * p - K) // S + 1
    downsample = (Cin != Cout) or (S != 1)

    assert Cout % 8 == 0, "Cout must be a multiple of 8 (sublane tile)"
    assert K % 2 == 1

    # batch-fold factor (samples folded into the lane axis per grid step)
    bblk = max(d for d in range(1, min(bblk, N) + 1) if N % d == 0)
    G = N // bblk

    Wrow = Wo + 2 * p                                   # flat row stride
    Lpad = _round_up((Ho + 2 * p) * Wrow + 2 * p, 128)  # per-sample lane extent
    Bfold = bblk * Lpad                                 # folded lane extent per step
    Cpad = _round_up(Cin, 8)                            # 8-aligned channel rows / phase
    SS = S * S
    Rin = SS * Cpad
    Hh = Ho + (K - 1) // S                              # polyphase plane rows
    Wh = Wo + (K - 1) // S                              # polyphase plane cols
    assert Hh * Wrow <= Lpad and Wh <= Wrow
    Wtot = Bfold + _round_up(max(((K - 1) // S) * (Wrow + 1), 1), 128)
    Wbuf = Bfold + _round_up(max((K - 1) * (Wrow + 1), 1), 128)

    # ---- polyphase, zero-padded, lane-flattened conv1/conv3 input (~1x raw bytes) ----
    x = x_nchw.astype(jnp.float32)
    xpad = jnp.pad(x, ((0, 0), (0, 0), (p, p), (p, p)))          # (N, Cin, H+2p, W+2p)
    planes = []
    for ph in range(S):
        for pw in range(S):
            pp = xpad[:, :, ph::S, pw::S][:, :, :Hh, :Wh]
            pp = jnp.pad(pp, ((0, 0), (0, 0),
                              (0, Hh - pp.shape[2]), (0, Wh - pp.shape[3])))
            planes.append(pp)                                     # (N, Cin, Hh, Wh)
    ph_arr = jnp.stack(planes, axis=1)                            # (N, SS, Cin, Hh, Wh)
    ph_arr = jnp.pad(ph_arr, ((0, 0), (0, 0), (0, Cpad - Cin),
                              (0, 0), (0, Wrow - Wh)))            # (N, SS, Cpad, Hh, Wrow)
    flat = ph_arr.reshape(N, SS, Cpad, Hh * Wrow)
    flat = jnp.pad(flat, ((0, 0), (0, 0), (0, 0), (0, Lpad - Hh * Wrow)))
    flat = flat.reshape(G, bblk, SS, Cpad, Lpad).transpose(0, 2, 3, 1, 4)
    flat = flat.reshape(G, Rin, Bfold)
    flat = jnp.pad(flat, ((0, 0), (0, 0), (0, Wtot - Bfold)))
    in1 = flat.reshape(G * Rin, Wtot).astype(matmul_dtype)

    # valid-pixel mask (same pattern for every sample), tiled over the folded batch
    m = jnp.zeros((Ho, Wrow), jnp.float32).at[:, :Wo].set(1.0)
    m = jnp.pad(m.reshape(1, Ho * Wrow), ((0, 0), (0, Lpad - Ho * Wrow)))
    mask = jnp.tile(m, (1, bblk))                                 # (1, Bfold)

    # weights: per-tap (Cout, C) matrices; channel params as (Cout, 1) columns
    w1 = jnp.zeros((K * K, Cout, Cpad), jnp.float32).at[:, :, :Cin].set(
        jnp.transpose(params["w1"], (2, 3, 0, 1)).reshape(K * K, Cout, Cin))
    w2 = jnp.transpose(params["w2"], (2, 3, 0, 1)).reshape(K * K, Cout, Cout)
    w3 = jnp.zeros((Cout, Cpad), jnp.float32).at[:, :Cin].set(
        params["w3"].reshape(Cout, Cin))
    w1 = w1.astype(matmul_dtype)
    w2 = w2.astype(matmul_dtype)
    w3 = w3.astype(matmul_dtype)
    col = lambda v: v.reshape(Cout, 1).astype(jnp.float32)

    kern = functools.partial(resblock_kernel, K=K, S=S, Cpad=Cpad, Wrow=Wrow,
                             Lpad=Lpad, Bblk=bblk, Ho=Ho, Wo=Wo,
                             use_conv3=downsample)

    def const_spec(arr):
        nd = arr.ndim
        return pl.BlockSpec(arr.shape, lambda g, _nd=nd: (0,) * _nd)

    ins = [in1, mask,
           w1, col(params["b1"]), col(params["g1"]), col(params["be1"]),
           w2, col(params["b2"]), col(params["g2"]), col(params["be2"]),
           w3, col(params["b3"]), col(params["g3"]), col(params["be3"])]
    in_specs = [pl.BlockSpec((Rin, Wtot), lambda g: (g, 0))]
    in_specs += [const_spec(a) for a in ins[1:]]

    # explicit scoped-VMEM limit sized from the actual double-buffered blocks + scratch
    vmem_need = 4 * (2 * Rin * Wtot + 2 * Cout * Bfold + Cout * Wbuf) + (2 << 20)
    vmem_limit = int(min(96 << 20, max(32 << 20, 4 * vmem_need)))

    out2d = pl.pallas_call(
        kern,
        out_shape=jax.ShapeDtypeStruct((G * Cout, Bfold), jnp.float32),
        grid_spec=pltpu.PrefetchScalarGridSpec(
            num_scalar_prefetch=0,
            grid=(G,),
            in_specs=in_specs,
            out_specs=pl.BlockSpec((Cout, Bfold), lambda g: (g, 0)),
            scratch_shapes=[pltpu.VMEM((Cout, Wbuf), matmul_dtype)],
        ),
        compiler_params=pltpu.CompilerParams(
            dimension_semantics=("parallel",),
            vmem_limit_bytes=vmem_limit),
    )(*ins)

    # (G*Cout, bblk*Lpad) -> NCHW, dropping pad columns (layout plumbing only)
    out = out2d.reshape(G, Cout, bblk, Lpad)[:, :, :, :Ho * Wrow]
    out = out.reshape(G, Cout, bblk, Ho, Wrow)[:, :, :, :, :Wo]
    return out.transpose(0, 2, 1, 3, 4).reshape(N, Cout, Ho, Wo)


# ------------------------------ pure-JAX reference --------------------------------
def _ref_conv(x, w, b, stride, pad):
    y = lax.conv_general_dilated(
        x, w, window_strides=(stride, stride),
        padding=[(pad, pad), (pad, pad)],
        dimension_numbers=("NCHW", "OIHW", "NCHW"))
    return y + b.reshape(1, -1, 1, 1)


def _ref_inorm(x, g, b):
    m = jnp.mean(x, axis=(2, 3), keepdims=True)
    v = jnp.mean((x - m) ** 2, axis=(2, 3), keepdims=True)
    return (x - m) * lax.rsqrt(v + EPS) * g.reshape(1, -1, 1, 1) + b.reshape(1, -1, 1, 1)


def res_block_reference(x, params, *, stride=2, k=3):
    out = _ref_conv(x, params["w1"], params["b1"], stride, k // 2)
    out = _leaky(_ref_inorm(out, params["g1"], params["be1"]))
    out = _ref_conv(out, params["w2"], params["b2"], 1, k // 2)
    out = _ref_inorm(out, params["g2"], params["be2"])
    res = _ref_conv(x, params["w3"], params["b3"], stride, 0)
    res = _ref_inorm(res, params["g3"], params["be3"])
    return _leaky(out + res)


if __name__ == "__main__":
    # ResBlock(dims=2, in_ch=4, out_ch=8, kernel_size=3, stride=2, norm='instance')
    N, Cin, H, W = 2, 4, 16, 16
    Cout, K, STRIDE = 8, 3, 2

    key = jax.random.PRNGKey(0)
    kx, *kp = jax.random.split(key, 14)

    params = {
        "w1": 0.1 * jax.random.normal(kp[0], (Cout, Cin, K, K), jnp.float32),
        "b1": 0.1 * jax.random.normal(kp[1], (Cout,), jnp.float32),
        "g1": 1.0 + 0.1 * jax.random.normal(kp[2], (Cout,), jnp.float32),
        "be1": 0.1 * jax.random.normal(kp[3], (Cout,), jnp.float32),
        "w2": 0.1 * jax.random.normal(kp[4], (Cout, Cout, K, K), jnp.float32),
        "b2": 0.1 * jax.random.normal(kp[5], (Cout,), jnp.float32),
        "g2": 1.0 + 0.1 * jax.random.normal(kp[6], (Cout,), jnp.float32),
        "be2": 0.1 * jax.random.normal(kp[7], (Cout,), jnp.float32),
        "w3": 0.1 * jax.random.normal(kp[8], (Cout, Cin, 1, 1), jnp.float32),
        "b3": 0.1 * jax.random.normal(kp[9], (Cout,), jnp.float32),
        "g3": 1.0 + 0.1 * jax.random.normal(kp[10], (Cout,), jnp.float32),
        "be3": 0.1 * jax.random.normal(kp[11], (Cout,), jnp.float32),
    }

    x = jax.random.normal(kx, (N, Cin, H, W), jnp.float32)

    out = jax.block_until_ready(res_block_forward(x, params, stride=STRIDE, k=K))
    ref = jax.block_until_ready(res_block_reference(x, params, stride=STRIDE, k=K))
    np.testing.assert_allclose(np.asarray(out), np.asarray(ref), rtol=1e-3, atol=1e-3)

    print("KERNEL_OK")
</pallas_src>

<mosaic_0001>
module attributes {stable_mosaic.version = 11 : i64} {
  func.func @resblock_kernel(%arg0: i32, %arg1: memref<32x384xf32, #tpu.memory_space<vmem>>, %arg2: memref<1x256xf32, #tpu.memory_space<vmem>>, %arg3: memref<9x8x8xf32, #tpu.memory_space<vmem>>, %arg4: memref<8x1xf32, #tpu.memory_space<vmem>>, %arg5: memref<8x1xf32, #tpu.memory_space<vmem>>, %arg6: memref<8x1xf32, #tpu.memory_space<vmem>>, %arg7: memref<9x8x8xf32, #tpu.memory_space<vmem>>, %arg8: memref<8x1xf32, #tpu.memory_space<vmem>>, %arg9: memref<8x1xf32, #tpu.memory_space<vmem>>, %arg10: memref<8x1xf32, #tpu.memory_space<vmem>>, %arg11: memref<8x8xf32, #tpu.memory_space<vmem>>, %arg12: memref<8x1xf32, #tpu.memory_space<vmem>>, %arg13: memref<8x1xf32, #tpu.memory_space<vmem>>, %arg14: memref<8x1xf32, #tpu.memory_space<vmem>>, %arg15: memref<8x256xf32, #tpu.memory_space<vmem>>, %arg16: memref<8x384xf32, #tpu.memory_space<vmem>>) attributes {dimension_semantics = [#tpu.dimension_semantics<parallel>], iteration_bounds = array<i64: 1>, scalar_prefetch = 0 : i64, scratch_operands = 1 : i64, tpu.core_type = #tpu.core_type<tc>, window_params = [{transform_indices = @transform_0, window_bounds = array<i64: 32, 384>}, {pipeline_mode = #tpu.pipeline_mode<synchronous>, transform_indices = @transform_1, window_bounds = array<i64: 1, 256>}, {pipeline_mode = #tpu.pipeline_mode<synchronous>, transform_indices = @transform_2, window_bounds = array<i64: 9, 8, 8>}, {pipeline_mode = #tpu.pipeline_mode<synchronous>, transform_indices = @transform_3, window_bounds = array<i64: 8, 1>}, {pipeline_mode = #tpu.pipeline_mode<synchronous>, transform_indices = @transform_4, window_bounds = array<i64: 8, 1>}, {pipeline_mode = #tpu.pipeline_mode<synchronous>, transform_indices = @transform_5, window_bounds = array<i64: 8, 1>}, {pipeline_mode = #tpu.pipeline_mode<synchronous>, transform_indices = @transform_6, window_bounds = array<i64: 9, 8, 8>}, {pipeline_mode = #tpu.pipeline_mode<synchronous>, transform_indices = @transform_7, window_bounds = array<i64: 8, 1>}, {pipeline_mode = #tpu.pipeline_mode<synchronous>, transform_indices = @transform_8, window_bounds = array<i64: 8, 1>}, {pipeline_mode = #tpu.pipeline_mode<synchronous>, transform_indices = @transform_9, window_bounds = array<i64: 8, 1>}, {pipeline_mode = #tpu.pipeline_mode<synchronous>, transform_indices = @transform_10, window_bounds = array<i64: 8, 8>}, {pipeline_mode = #tpu.pipeline_mode<synchronous>, transform_indices = @transform_11, window_bounds = array<i64: 8, 1>}, {pipeline_mode = #tpu.pipeline_mode<synchronous>, transform_indices = @transform_12, window_bounds = array<i64: 8, 1>}, {pipeline_mode = #tpu.pipeline_mode<synchronous>, transform_indices = @transform_13, window_bounds = array<i64: 8, 1>}, {transform_indices = @transform_14, window_bounds = array<i64: 8, 256>}]} {
    %c0 = arith.constant 0 : index
    %c0_0 = arith.constant 0 : index
    %0 = vector.load %arg2[%c0, %c0_0] : memref<1x256xf32, #tpu.memory_space<vmem>>, vector<1x256xf32>
    %1 = vector.extract_strided_slice %0 {offsets = [0, 0], sizes = [1, 128], strides = [1, 1]} : vector<1x256xf32> to vector<1x128xf32>
    %cst = arith.constant 0.000000e+00 : f32
    %2 = vector.broadcast %cst : f32 to vector<8x256xf32>
    %c0_1 = arith.constant 0 : index
    %c0_2 = arith.constant 0 : index
    %3 = vector.load %arg1[%c0_1, %c0_2] : memref<32x384xf32, #tpu.memory_space<vmem>>, vector<8x256xf32>
    %c0_3 = arith.constant 0 : index
    %c0_4 = arith.constant 0 : index
    %c0_5 = arith.constant 0 : index
    %4 = vector.load %arg3[%c0_3, %c0_4, %c0_5] : memref<9x8x8xf32, #tpu.memory_space<vmem>>, vector<1x8x8xf32>
    %5 = vector.shape_cast %4 : vector<1x8x8xf32> to vector<8x8xf32>
    %cst_6 = arith.constant dense<0.000000e+00> : vector<8x256xf32>
    %6 = tpu.matmul %5, %3, %cst_6 {dimension_numbers = #tpu.dot_dimension_numbers<[1], [0], [0], [1], [0, 0, 1, 1], [], []>} : vector<8x8xf32>, vector<8x256xf32>, vector<8x256xf32> -> vector<8x256xf32>
    %7 = arith.addf %2, %6 : vector<8x256xf32>
    %c8 = arith.constant 8 : index
    %c0_7 = arith.constant 0 : index
    %8 = vector.load %arg1[%c8, %c0_7] : memref<32x384xf32, #tpu.memory_space<vmem>>, vector<8x256xf32>
    %c1 = arith.constant 1 : index
    %c0_8 = arith.constant 0 : index
    %c0_9 = arith.constant 0 : index
    %9 = vector.load %arg3[%c1, %c0_8, %c0_9] : memref<9x8x8xf32, #tpu.memory_space<vmem>>, vector<1x8x8xf32>
    %10 = vector.shape_cast %9 : vector<1x8x8xf32> to vector<8x8xf32>
    %cst_10 = arith.constant dense<0.000000e+00> : vector<8x256xf32>
    %11 = tpu.matmul %10, %8, %cst_10 {dimension_numbers = #tpu.dot_dimension_numbers<[1], [0], [0], [1], [0, 0, 1, 1], [], []>} : vector<8x8xf32>, vector<8x256xf32>, vector<8x256xf32> -> vector<8x256xf32>
    %12 = arith.addf %7, %11 : vector<8x256xf32>
    %c0_11 = arith.constant 0 : index
    %c1_12 = arith.constant 1 : index
    %13 = vector.load %arg1[%c0_11, %c1_12] : memref<32x384xf32, #tpu.memory_space<vmem>>, vector<8x256xf32>
    %c2 = arith.constant 2 : index
    %c0_13 = arith.constant 0 : index
    %c0_14 = arith.constant 0 : index
    %14 = vector.load %arg3[%c2, %c0_13, %c0_14] : memref<9x8x8xf32, #tpu.memory_space<vmem>>, vector<1x8x8xf32>
    %15 = vector.shape_cast %14 : vector<1x8x8xf32> to vector<8x8xf32>
    %cst_15 = arith.constant dense<0.000000e+00> : vector<8x256xf32>
    %16 = tpu.matmul %15, %13, %cst_15 {dimension_numbers = #tpu.dot_dimension_numbers<[1], [0], [0], [1], [0, 0, 1, 1], [], []>} : vector<8x8xf32>, vector<8x256xf32>, vector<8x256xf32> -> vector<8x256xf32>
    %17 = arith.addf %12, %16 : vector<8x256xf32>
    %c16 = arith.constant 16 : index
    %c0_16 = arith.constant 0 : index
    %18 = vector.load %arg1[%c16, %c0_16] : memref<32x384xf32, #tpu.memory_space<vmem>>, vector<8x256xf32>
    %c3 = arith.constant 3 : index
    %c0_17 = arith.constant 0 : index
    %c0_18 = arith.constant 0 : index
    %19 = vector.load %arg3[%c3, %c0_17, %c0_18] : memref<9x8x8xf32, #tpu.memory_space<vmem>>, vector<1x8x8xf32>
    %20 = vector.shape_cast %19 : vector<1x8x8xf32> to vector<8x8xf32>
    %cst_19 = arith.constant dense<0.000000e+00> : vector<8x256xf32>
    %21 = tpu.matmul %20, %18, %cst_19 {dimension_numbers = #tpu.dot_dimension_numbers<[1], [0], [0], [1], [0, 0, 1, 1], [], []>} : vector<8x8xf32>, vector<8x256xf32>, vector<8x256xf32> -> vector<8x256xf32>
    %22 = arith.addf %17, %21 : vector<8x256xf32>
    %c24 = arith.constant 24 : index
    %c0_20 = arith.constant 0 : index
    %23 = vector.load %arg1[%c24, %c0_20] : memref<32x384xf32, #tpu.memory_space<vmem>>, vector<8x256xf32>
    %c4 = arith.constant 4 : index
    %c0_21 = arith.constant 0 : index
    %c0_22 = arith.constant 0 : index
    %24 = vector.load %arg3[%c4, %c0_21, %c0_22] : memref<9x8x8xf32, #tpu.memory_space<vmem>>, vector<1x8x8xf32>
    %25 = vector.shape_cast %24 : vector<1x8x8xf32> to vector<8x8xf32>
    %cst_23 = arith.constant dense<0.000000e+00> : vector<8x256xf32>
    %26 = tpu.matmul %25, %23, %cst_23 {dimension_numbers = #tpu.dot_dimension_numbers<[1], [0], [0], [1], [0, 0, 1, 1], [], []>} : vector<8x8xf32>, vector<8x256xf32>, vector<8x256xf32> -> vector<8x256xf32>
    %27 = arith.addf %22, %26 : vector<8x256xf32>
    %c16_24 = arith.constant 16 : index
    %c1_25 = arith.constant 1 : index
    %28 = vector.load %arg1[%c16_24, %c1_25] : memref<32x384xf32, #tpu.memory_space<vmem>>, vector<8x256xf32>
    %c5 = arith.constant 5 : index
    %c0_26 = arith.constant 0 : index
    %c0_27 = arith.constant 0 : index
    %29 = vector.load %arg3[%c5, %c0_26, %c0_27] : memref<9x8x8xf32, #tpu.memory_space<vmem>>, vector<1x8x8xf32>
    %30 = vector.shape_cast %29 : vector<1x8x8xf32> to vector<8x8xf32>
    %cst_28 = arith.constant dense<0.000000e+00> : vector<8x256xf32>
    %31 = tpu.matmul %30, %28, %cst_28 {dimension_numbers = #tpu.dot_dimension_numbers<[1], [0], [0], [1], [0, 0, 1, 1], [], []>} : vector<8x8xf32>, vector<8x256xf32>, vector<8x256xf32> -> vector<8x256xf32>
    %32 = arith.addf %27, %31 : vector<8x256xf32>
    %c0_29 = arith.constant 0 : index
    %c10 = arith.constant 10 : index
    %33 = vector.load %arg1[%c0_29, %c10] : memref<32x384xf32, #tpu.memory_space<vmem>>, vector<8x256xf32>
    %c6 = arith.constant 6 : index
    %c0_30 = arith.constant 0 : index
    %c0_31 = arith.constant 0 : index
    %34 = vector.load %arg3[%c6, %c0_30, %c0_31] : memref<9x8x8xf32, #tpu.memory_space<vmem>>, vector<1x8x8xf32>
    %35 = vector.shape_cast %34 : vector<1x8x8xf32> to vector<8x8xf32>
    %cst_32 = arith.constant dense<0.000000e+00> : vector<8x256xf32>
    %36 = tpu.matmul %35, %33, %cst_32 {dimension_numbers = #tpu.dot_dimension_numbers<[1], [0], [0], [1], [0, 0, 1, 1], [], []>} : vector<8x8xf32>, vector<8x256xf32>, vector<8x256xf32> -> vector<8x256xf32>
    %37 = arith.addf %32, %36 : vector<8x256xf32>
    %c8_33 = arith.constant 8 : index
    %c10_34 = arith.constant 10 : index
    %38 = vector.load %arg1[%c8_33, %c10_34] : memref<32x384xf32, #tpu.memory_space<vmem>>, vector<8x256xf32>
    %c7 = arith.constant 7 : index
    %c0_35 = arith.constant 0 : index
    %c0_36 = arith.constant 0 : index
    %39 = vector.load %arg3[%c7, %c0_35, %c0_36] : memref<9x8x8xf32, #tpu.memory_space<vmem>>, vector<1x8x8xf32>
    %40 = vector.shape_cast %39 : vector<1x8x8xf32> to vector<8x8xf32>
    %cst_37 = arith.constant dense<0.000000e+00> : vector<8x256xf32>
    %41 = tpu.matmul %40, %38, %cst_37 {dimension_numbers = #tpu.dot_dimension_numbers<[1], [0], [0], [1], [0, 0, 1, 1], [], []>} : vector<8x8xf32>, vector<8x256xf32>, vector<8x256xf32> -> vector<8x256xf32>
    %42 = arith.addf %37, %41 : vector<8x256xf32>
    %c0_38 = arith.constant 0 : index
    %c11 = arith.constant 11 : index
    %43 = vector.load %arg1[%c0_38, %c11] : memref<32x384xf32, #tpu.memory_space<vmem>>, vector<8x256xf32>
    %c8_39 = arith.constant 8 : index
    %c0_40 = arith.constant 0 : index
    %c0_41 = arith.constant 0 : index
    %44 = vector.load %arg3[%c8_39, %c0_40, %c0_41] : memref<9x8x8xf32, #tpu.memory_space<vmem>>, vector<1x8x8xf32>
    %45 = vector.shape_cast %44 : vector<1x8x8xf32> to vector<8x8xf32>
    %cst_42 = arith.constant dense<0.000000e+00> : vector<8x256xf32>
    %46 = tpu.matmul %45, %43, %cst_42 {dimension_numbers = #tpu.dot_dimension_numbers<[1], [0], [0], [1], [0, 0, 1, 1], [], []>} : vector<8x8xf32>, vector<8x256xf32>, vector<8x256xf32> -> vector<8x256xf32>
    %47 = arith.addf %42, %46 : vector<8x256xf32>
    %c0_43 = arith.constant 0 : index
    %c0_44 = arith.constant 0 : index
    %48 = vector.load %arg4[%c0_43, %c0_44] : memref<8x1xf32, #tpu.memory_space<vmem>>, vector<8x1xf32>
    %49 = vector.broadcast %48 : vector<8x1xf32> to vector<8x256xf32>
    %50 = arith.addf %47, %49 : vector<8x256xf32>
    %c0_45 = arith.constant 0 : index
    %c0_46 = arith.constant 0 : index
    %51 = vector.load %arg5[%c0_45, %c0_46] : memref<8x1xf32, #tpu.memory_space<vmem>>, vector<8x1xf32>
    %c0_47 = arith.constant 0 : index
    %c0_48 = arith.constant 0 : index
    %52 = vector.load %arg6[%c0_47, %c0_48] : memref<8x1xf32, #tpu.memory_space<vmem>>, vector<8x1xf32>
    %53 = vector.extract_strided_slice %50 {offsets = [0, 0], sizes = [8, 128], strides = [1, 1]} : vector<8x256xf32> to vector<8x128xf32>
    %54 = vector.broadcast %1 : vector<1x128xf32> to vector<8x128xf32>
    %55 = arith.mulf %53, %54 : vector<8x128xf32>
    %cst_49 = arith.constant dense<0.000000e+00> : vector<8xf32>
    %56 = vector.multi_reduction <add>, %55, %cst_49 [1] : vector<8x128xf32> to vector<8xf32>
    %57 = vector.shape_cast %56 : vector<8xf32> to vector<8x1xf32>
    %cst_50 = arith.constant 1.562500e-02 : f32
    %58 = vector.broadcast %cst_50 : f32 to vector<8x1xf32>
    %59 = arith.mulf %57, %58 : vector<8x1xf32>
    %60 = vector.broadcast %59 : vector<8x1xf32> to vector<8x128xf32>
    %61 = arith.subf %53, %60 : vector<8x128xf32>
    %62 = arith.mulf %61, %61 : vector<8x128xf32>
    %63 = vector.broadcast %1 : vector<1x128xf32> to vector<8x128xf32>
    %64 = arith.mulf %62, %63 : vector<8x128xf32>
    %cst_51 = arith.constant dense<0.000000e+00> : vector<8xf32>
    %65 = vector.multi_reduction <add>, %64, %cst_51 [1] : vector<8x128xf32> to vector<8xf32>
    %66 = vector.shape_cast %65 : vector<8xf32> to vector<8x1xf32>
    %cst_52 = arith.constant 1.562500e-02 : f32
    %67 = vector.broadcast %cst_52 : f32 to vector<8x1xf32>
    %68 = arith.mulf %66, %67 : vector<8x1xf32>
    %cst_53 = arith.constant 9.99999974E-6 : f32
    %69 = vector.broadcast %cst_53 : f32 to vector<8x1xf32>
    %70 = arith.addf %68, %69 : vector<8x1xf32>
    %71 = math.rsqrt %70 : vector<8x1xf32>
    %72 = vector.broadcast %71 : vector<8x1xf32> to vector<8x128xf32>
    %73 = arith.mulf %61, %72 : vector<8x128xf32>
    %74 = vector.extract_strided_slice %50 {offsets = [0, 128], sizes = [8, 128], strides = [1, 1]} : vector<8x256xf32> to vector<8x128xf32>
    %75 = vector.broadcast %1 : vector<1x128xf32> to vector<8x128xf32>
    %76 = arith.mulf %74, %75 : vector<8x128xf32>
    %cst_54 = arith.constant dense<0.000000e+00> : vector<8xf32>
    %77 = vector.multi_reduction <add>, %76, %cst_54 [1] : vector<8x128xf32> to vector<8xf32>
    %78 = vector.shape_cast %77 : vector<8xf32> to vector<8x1xf32>
    %cst_55 = arith.constant 1.562500e-02 : f32
    %79 = vector.broadcast %cst_55 : f32 to vector<8x1xf32>
    %80 = arith.mulf %78, %79 : vector<8x1xf32>
    %81 = vector.broadcast %80 : vector<8x1xf32> to vector<8x128xf32>
    %82 = arith.subf %74, %81 : vector<8x128xf32>
    %83 = arith.mulf %82, %82 : vector<8x128xf32>
    %84 = vector.broadcast %1 : vector<1x128xf32> to vector<8x128xf32>
    %85 = arith.mulf %83, %84 : vector<8x128xf32>
    %cst_56 = arith.constant dense<0.000000e+00> : vector<8xf32>
    %86 = vector.multi_reduction <add>, %85, %cst_56 [1] : vector<8x128xf32> to vector<8xf32>
    %87 = vector.shape_cast %86 : vector<8xf32> to vector<8x1xf32>
    %cst_57 = arith.constant 1.562500e-02 : f32
    %88 = vector.broadcast %cst_57 : f32 to vector<8x1xf32>
    %89 = arith.mulf %87, %88 : vector<8x1xf32>
    %cst_58 = arith.constant 9.99999974E-6 : f32
    %90 = vector.broadcast %cst_58 : f32 to vector<8x1xf32>
    %91 = arith.addf %89, %90 : vector<8x1xf32>
    %92 = math.rsqrt %91 : vector<8x1xf32>
    %93 = vector.broadcast %92 : vector<8x1xf32> to vector<8x128xf32>
    %94 = arith.mulf %82, %93 : vector<8x128xf32>
    %95 = tpu.concatenate %73, %94 in 1 : vector<8x128xf32>, vector<8x128xf32> -> vector<8x256xf32>
    %96 = vector.broadcast %51 : vector<8x1xf32> to vector<8x256xf32>
    %97 = arith.mulf %95, %96 : vector<8x256xf32>
    %98 = vector.broadcast %52 : vector<8x1xf32> to vector<8x256xf32>
    %99 = arith.addf %97, %98 : vector<8x256xf32>
    %cst_59 = arith.constant 0.000000e+00 : f32
    %100 = vector.broadcast %cst_59 : f32 to vector<8x256xf32>
    %101 = arith.cmpf oge, %99, %100 : vector<8x256xf32>
    %cst_60 = arith.constant 0.00999999977 : f32
    %102 = vector.broadcast %cst_60 : f32 to vector<8x256xf32>
    %103 = arith.mulf %102, %99 : vector<8x256xf32>
    %104 = arith.select %101, %99, %103 : vector<8x256xi1>, vector<8x256xf32>
    %105 = vector.broadcast %0 : vector<1x256xf32> to vector<8x256xf32>
    %106 = arith.mulf %104, %105 : vector<8x256xf32>
    %cst_61 = arith.constant 0.000000e+00 : f32
    %107 = vector.broadcast %cst_61 : f32 to vector<8x11xf32>
    %c0_62 = arith.constant 0 : index
    %c0_63 = arith.constant 0 : index
    %108 = vector.load %arg16[%c0_62, %c0_63] : memref<8x384xf32, #tpu.memory_space<vmem>>, vector<8x11xf32>
    tpu.vector_store %arg16[%c0_62, %c0_63], %107 {strides = array<i32>} : memref<8x384xf32, #tpu.memory_space<vmem>>, vector<8x11xf32>,
    %cst_64 = arith.constant 0.000000e+00 : f32
    %109 = vector.broadcast %cst_64 : f32 to vector<8x117xf32>
    %c0_65 = arith.constant 0 : index
    %c267 = arith.constant 267 : index
    %110 = vector.load %arg16[%c0_65, %c267] : memref<8x384xf32, #tpu.memory_space<vmem>>, vector<8x117xf32>
    tpu.vector_store %arg16[%c0_65, %c267], %109 {strides = array<i32>} : memref<8x384xf32, #tpu.memory_space<vmem>>, vector<8x117xf32>,
    %c0_66 = arith.constant 0 : index
    %c11_67 = arith.constant 11 : index
    %111 = vector.load %arg16[%c0_66, %c11_67] : memref<8x384xf32, #tpu.memory_space<vmem>>, vector<8x256xf32>
    tpu.vector_store %arg16[%c0_66, %c11_67], %106 {strides = array<i32>} : memref<8x384xf32, #tpu.memory_space<vmem>>, vector<8x256xf32>,
    %cst_68 = arith.constant 0.000000e+00 : f32
    %112 = vector.broadcast %cst_68 : f32 to vector<8x256xf32>
    %c0_69 = arith.constant 0 : index
    %c0_70 = arith.constant 0 : index
    %113 = vector.load %arg16[%c0_69, %c0_70] : memref<8x384xf32, #tpu.memory_space<vmem>>, vector<8x256xf32>
    %c0_71 = arith.constant 0 : index
    %c0_72 = arith.constant 0 : index
    %c0_73 = arith.constant 0 : index
    %114 = vector.load %arg7[%c0_71, %c0_72, %c0_73] : memref<9x8x8xf32, #tpu.memory_space<vmem>>, vector<1x8x8xf32>
    %115 = vector.shape_cast %114 : vector<1x8x8xf32> to vector<8x8xf32>
    %cst_74 = arith.constant dense<0.000000e+00> : vector<8x256xf32>
    %116 = tpu.matmul %115, %113, %cst_74 {dimension_numbers = #tpu.dot_dimension_numbers<[1], [0], [0], [1], [0, 0, 1, 1], [], []>} : vector<8x8xf32>, vector<8x256xf32>, vector<8x256xf32> -> vector<8x256xf32>
    %117 = arith.addf %112, %116 : vector<8x256xf32>
    %c0_75 = arith.constant 0 : index
    %c1_76 = arith.constant 1 : index
    %118 = vector.load %arg16[%c0_75, %c1_76] : memref<8x384xf32, #tpu.memory_space<vmem>>, vector<8x256xf32>
    %c1_77 = arith.constant 1 : index
    %c0_78 = arith.constant 0 : index
    %c0_79 = arith.constant 0 : index
    %119 = vector.load %arg7[%c1_77, %c0_78, %c0_79] : memref<9x8x8xf32, #tpu.memory_space<vmem>>, vector<1x8x8xf32>
    %120 = vector.shape_cast %119 : vector<1x8x8xf32> to vector<8x8xf32>
    %cst_80 = arith.constant dense<0.000000e+00> : vector<8x256xf32>
    %121 = tpu.matmul %120, %118, %cst_80 {dimension_numbers = #tpu.dot_dimension_numbers<[1], [0], [0], [1], [0, 0, 1, 1], [], []>} : vector<8x8xf32>, vector<8x256xf32>, vector<8x256xf32> -> vector<8x256xf32>
    %122 = arith.addf %117, %121 : vector<8x256xf32>
    %c0_81 = arith.constant 0 : index
    %c2_82 = arith.constant 2 : index
    %123 = vector.load %arg16[%c0_81, %c2_82] : memref<8x384xf32, #tpu.memory_space<vmem>>, vector<8x256xf32>
    %c2_83 = arith.constant 2 : index
    %c0_84 = arith.constant 0 : index
    %c0_85 = arith.constant 0 : index
    %124 = vector.load %arg7[%c2_83, %c0_84, %c0_85] : memref<9x8x8xf32, #tpu.memory_space<vmem>>, vector<1x8x8xf32>
    %125 = vector.shape_cast %124 : vector<1x8x8xf32> to vector<8x8xf32>
    %cst_86 = arith.constant dense<0.000000e+00> : vector<8x256xf32>
    %126 = tpu.matmul %125, %123, %cst_86 {dimension_numbers = #tpu.dot_dimension_numbers<[1], [0], [0], [1], [0, 0, 1, 1], [], []>} : vector<8x8xf32>, vector<8x256xf32>, vector<8x256xf32> -> vector<8x256xf32>
    %127 = arith.addf %122, %126 : vector<8x256xf32>
    %c0_87 = arith.constant 0 : index
    %c10_88 = arith.constant 10 : index
    %128 = vector.load %arg16[%c0_87, %c10_88] : memref<8x384xf32, #tpu.memory_space<vmem>>, vector<8x256xf32>
    %c3_89 = arith.constant 3 : index
    %c0_90 = arith.constant 0 : index
    %c0_91 = arith.constant 0 : index
    %129 = vector.load %arg7[%c3_89, %c0_90, %c0_91] : memref<9x8x8xf32, #tpu.memory_space<vmem>>, vector<1x8x8xf32>
    %130 = vector.shape_cast %129 : vector<1x8x8xf32> to vector<8x8xf32>
    %cst_92 = arith.constant dense<0.000000e+00> : vector<8x256xf32>
    %131 = tpu.matmul %130, %128, %cst_92 {dimension_numbers = #tpu.dot_dimension_numbers<[1], [0], [0], [1], [0, 0, 1, 1], [], []>} : vector<8x8xf32>, vector<8x256xf32>, vector<8x256xf32> -> vector<8x256xf32>
    %132 = arith.addf %127, %131 : vector<8x256xf32>
    %c0_93 = arith.constant 0 : index
    %c11_94 = arith.constant 11 : index
    %133 = vector.load %arg16[%c0_93, %c11_94] : memref<8x384xf32, #tpu.memory_space<vmem>>, vector<8x256xf32>
    %c4_95 = arith.constant 4 : index
    %c0_96 = arith.constant 0 : index
    %c0_97 = arith.constant 0 : index
    %134 = vector.load %arg7[%c4_95, %c0_96, %c0_97] : memref<9x8x8xf32, #tpu.memory_space<vmem>>, vector<1x8x8xf32>
    %135 = vector.shape_cast %134 : vector<1x8x8xf32> to vector<8x8xf32>
    %cst_98 = arith.constant dense<0.000000e+00> : vector<8x256xf32>
    %136 = tpu.matmul %135, %133, %cst_98 {dimension_numbers = #tpu.dot_dimension_numbers<[1], [0], [0], [1], [0, 0, 1, 1], [], []>} : vector<8x8xf32>, vector<8x256xf32>, vector<8x256xf32> -> vector<8x256xf32>
    %137 = arith.addf %132, %136 : vector<8x256xf32>
    %c0_99 = arith.constant 0 : index
    %c12 = arith.constant 12 : index
    %138 = vector.load %arg16[%c0_99, %c12] : memref<8x384xf32, #tpu.memory_space<vmem>>, vector<8x256xf32>
    %c5_100 = arith.constant 5 : index
    %c0_101 = arith.constant 0 : index
    %c0_102 = arith.constant 0 : index
    %139 = vector.load %arg7[%c5_100, %c0_101, %c0_102] : memref<9x8x8xf32, #tpu.memory_space<vmem>>, vector<1x8x8xf32>
    %140 = vector.shape_cast %139 : vector<1x8x8xf32> to vector<8x8xf32>
    %cst_103 = arith.constant dense<0.000000e+00> : vector<8x256xf32>
    %141 = tpu.matmul %140, %138, %cst_103 {dimension_numbers = #tpu.dot_dimension_numbers<[1], [0], [0], [1], [0, 0, 1, 1], [], []>} : vector<8x8xf32>, vector<8x256xf32>, vector<8x256xf32> -> vector<8x256xf32>
    %142 = arith.addf %137, %141 : vector<8x256xf32>
    %c0_104 = arith.constant 0 : index
    %c20 = arith.constant 20 : index
    %143 = vector.load %arg16[%c0_104, %c20] : memref<8x384xf32, #tpu.memory_space<vmem>>, vector<8x256xf32>
    %c6_105 = arith.constant 6 : index
    %c0_106 = arith.constant 0 : index
    %c0_107 = arith.constant 0 : index
    %144 = vector.load %arg7[%c6_105, %c0_106, %c0_107] : memref<9x8x8xf32, #tpu.memory_space<vmem>>, vector<1x8x8xf32>
    %145 = vector.shape_cast %144 : vector<1x8x8xf32> to vector<8x8xf32>
    %cst_108 = arith.constant dense<0.000000e+00> : vector<8x256xf32>
    %146 = tpu.matmul %145, %143, %cst_108 {dimension_numbers = #tpu.dot_dimension_numbers<[1], [0], [0], [1], [0, 0, 1, 1], [], []>} : vector<8x8xf32>, vector<8x256xf32>, vector<8x256xf32> -> vector<8x256xf32>
    %147 = arith.addf %142, %146 : vector<8x256xf32>
    %c0_109 = arith.constant 0 : index
    %c21 = arith.constant 21 : index
    %148 = vector.load %arg16[%c0_109, %c21] : memref<8x384xf32, #tpu.memory_space<vmem>>, vector<8x256xf32>
    %c7_110 = arith.constant 7 : index
    %c0_111 = arith.constant 0 : index
    %c0_112 = arith.constant 0 : index
    %149 = vector.load %arg7[%c7_110, %c0_111, %c0_112] : memref<9x8x8xf32, #tpu.memory_space<vmem>>, vector<1x8x8xf32>
    %150 = vector.shape_cast %149 : vector<1x8x8xf32> to vector<8x8xf32>
    %cst_113 = arith.constant dense<0.000000e+00> : vector<8x256xf32>
    %151 = tpu.matmul %150, %148, %cst_113 {dimension_numbers = #tpu.dot_dimension_numbers<[1], [0], [0], [1], [0, 0, 1, 1], [], []>} : vector<8x8xf32>, vector<8x256xf32>, vector<8x256xf32> -> vector<8x256xf32>
    %152 = arith.addf %147, %151 : vector<8x256xf32>
    %c0_114 = arith.constant 0 : index
    %c22 = arith.constant 22 : index
    %153 = vector.load %arg16[%c0_114, %c22] : memref<8x384xf32, #tpu.memory_space<vmem>>, vector<8x256xf32>
    %c8_115 = arith.constant 8 : index
    %c0_116 = arith.constant 0 : index
    %c0_117 = arith.constant 0 : index
    %154 = vector.load %arg7[%c8_115, %c0_116, %c0_117] : memref<9x8x8xf32, #tpu.memory_space<vmem>>, vector<1x8x8xf32>
    %155 = vector.shape_cast %154 : vector<1x8x8xf32> to vector<8x8xf32>
    %cst_118 = arith.constant dense<0.000000e+00> : vector<8x256xf32>
    %156 = tpu.matmul %155, %153, %cst_118 {dimension_numbers = #tpu.dot_dimension_numbers<[1], [0], [0], [1], [0, 0, 1, 1], [], []>} : vector<8x8xf32>, vector<8x256xf32>, vector<8x256xf32> -> vector<8x256xf32>
    %157 = arith.addf %152, %156 : vector<8x256xf32>
    %c0_119 = arith.constant 0 : index
    %c0_120 = arith.constant 0 : index
    %158 = vector.load %arg8[%c0_119, %c0_120] : memref<8x1xf32, #tpu.memory_space<vmem>>, vector<8x1xf32>
    %159 = vector.broadcast %158 : vector<8x1xf32> to vector<8x256xf32>
    %160 = arith.addf %157, %159 : vector<8x256xf32>
    %c0_121 = arith.constant 0 : index
    %c0_122 = arith.constant 0 : index
    %161 = vector.load %arg9[%c0_121, %c0_122] : memref<8x1xf32, #tpu.memory_space<vmem>>, vector<8x1xf32>
    %c0_123 = arith.constant 0 : index
    %c0_124 = arith.constant 0 : index
    %162 = vector.load %arg10[%c0_123, %c0_124] : memref<8x1xf32, #tpu.memory_space<vmem>>, vector<8x1xf32>
    %163 = vector.extract_strided_slice %160 {offsets = [0, 0], sizes = [8, 128], strides = [1, 1]} : vector<8x256xf32> to vector<8x128xf32>
    %164 = vector.broadcast %1 : vector<1x128xf32> to vector<8x128xf32>
    %165 = arith.mulf %163, %164 : vector<8x128xf32>
    %cst_125 = arith.constant dense<0.000000e+00> : vector<8xf32>
    %166 = vector.multi_reduction <add>, %165, %cst_125 [1] : vector<8x128xf32> to vector<8xf32>
    %167 = vector.shape_cast %166 : vector<8xf32> to vector<8x1xf32>
    %cst_126 = arith.constant 1.562500e-02 : f32
    %168 = vector.broadcast %cst_126 : f32 to vector<8x1xf32>
    %169 = arith.mulf %167, %168 : vector<8x1xf32>
    %170 = vector.broadcast %169 : vector<8x1xf32> to vector<8x128xf32>
    %171 = arith.subf %163, %170 : vector<8x128xf32>
    %172 = arith.mulf %171, %171 : vector<8x128xf32>
    %173 = vector.broadcast %1 : vector<1x128xf32> to vector<8x128xf32>
    %174 = arith.mulf %172, %173 : vector<8x128xf32>
    %cst_127 = arith.constant dense<0.000000e+00> : vector<8xf32>
    %175 = vector.multi_reduction <add>, %174, %cst_127 [1] : vector<8x128xf32> to vector<8xf32>
    %176 = vector.shape_cast %175 : vector<8xf32> to vector<8x1xf32>
    %cst_128 = arith.constant 1.562500e-02 : f32
    %177 = vector.broadcast %cst_128 : f32 to vector<8x1xf32>
    %178 = arith.mulf %176, %177 : vector<8x1xf32>
    %cst_129 = arith.constant 9.99999974E-6 : f32
    %179 = vector.broadcast %cst_129 : f32 to vector<8x1xf32>
    %180 = arith.addf %178, %179 : vector<8x1xf32>
    %181 = math.rsqrt %180 : vector<8x1xf32>
    %182 = vector.broadcast %181 : vector<8x1xf32> to vector<8x128xf32>
    %183 = arith.mulf %171, %182 : vector<8x128xf32>
    %184 = vector.extract_strided_slice %160 {offsets = [0, 128], sizes = [8, 128], strides = [1, 1]} : vector<8x256xf32> to vector<8x128xf32>
    %185 = vector.broadcast %1 : vector<1x128xf32> to vector<8x128xf32>
    %186 = arith.mulf %184, %185 : vector<8x128xf32>
    %cst_130 = arith.constant dense<0.000000e+00> : vector<8xf32>
    %187 = vector.multi_reduction <add>, %186, %cst_130 [1] : vector<8x128xf32> to vector<8xf32>
    %188 = vector.shape_cast %187 : vector<8xf32> to vector<8x1xf32>
    %cst_131 = arith.constant 1.562500e-02 : f32
    %189 = vector.broadcast %cst_131 : f32 to vector<8x1xf32>
    %190 = arith.mulf %188, %189 : vector<8x1xf32>
    %191 = vector.broadcast %190 : vector<8x1xf32> to vector<8x128xf32>
    %192 = arith.subf %184, %191 : vector<8x128xf32>
    %193 = arith.mulf %192, %192 : vector<8x128xf32>
    %194 = vector.broadcast %1 : vector<1x128xf32> to vector<8x128xf32>
    %195 = arith.mulf %193, %194 : vector<8x128xf32>
    %cst_132 = arith.constant dense<0.000000e+00> : vector<8xf32>
    %196 = vector.multi_reduction <add>, %195, %cst_132 [1] : vector<8x128xf32> to vector<8xf32>
    %197 = vector.shape_cast %196 : vector<8xf32> to vector<8x1xf32>
    %cst_133 = arith.constant 1.562500e-02 : f32
    %198 = vector.broadcast %cst_133 : f32 to vector<8x1xf32>
    %199 = arith.mulf %197, %198 : vector<8x1xf32>
    %cst_134 = arith.constant 9.99999974E-6 : f32
    %200 = vector.broadcast %cst_134 : f32 to vector<8x1xf32>
    %201 = arith.addf %199, %200 : vector<8x1xf32>
    %202 = math.rsqrt %201 : vector<8x1xf32>
    %203 = vector.broadcast %202 : vector<8x1xf32> to vector<8x128xf32>
    %204 = arith.mulf %192, %203 : vector<8x128xf32>
    %205 = tpu.concatenate %183, %204 in 1 : vector<8x128xf32>, vector<8x128xf32> -> vector<8x256xf32>
    %206 = vector.broadcast %161 : vector<8x1xf32> to vector<8x256xf32>
    %207 = arith.mulf %205, %206 : vector<8x256xf32>
    %208 = vector.broadcast %162 : vector<8x1xf32> to vector<8x256xf32>
    %209 = arith.addf %207, %208 : vector<8x256xf32>
    %c24_135 = arith.constant 24 : index
    %c0_136 = arith.constant 0 : index
    %210 = vector.load %arg1[%c24_135, %c0_136] : memref<32x384xf32, #tpu.memory_space<vmem>>, vector<8x256xf32>
    %c0_137 = arith.constant 0 : index
    %c0_138 = arith.constant 0 : index
    %211 = vector.load %arg11[%c0_137, %c0_138] : memref<8x8xf32, #tpu.memory_space<vmem>>, vector<8x8xf32>
    %cst_139 = arith.constant dense<0.000000e+00> : vector<8x256xf32>
    %212 = tpu.matmul %211, %210, %cst_139 {dimension_numbers = #tpu.dot_dimension_numbers<[1], [0], [0], [1], [0, 0, 1, 1], [], []>} : vector<8x8xf32>, vector<8x256xf32>, vector<8x256xf32> -> vector<8x256xf32>
    %c0_140 = arith.constant 0 : index
    %c0_141 = arith.constant 0 : index
    %213 = vector.load %arg12[%c0_140, %c0_141] : memref<8x1xf32, #tpu.memory_space<vmem>>, vector<8x1xf32>
    %214 = vector.broadcast %213 : vector<8x1xf32> to vector<8x256xf32>
    %215 = arith.addf %212, %214 : vector<8x256xf32>
    %c0_142 = arith.constant 0 : index
    %c0_143 = arith.constant 0 : index
    %216 = vector.load %arg13[%c0_142, %c0_143] : memref<8x1xf32, #tpu.memory_space<vmem>>, vector<8x1xf32>
    %c0_144 = arith.constant 0 : index
    %c0_145 = arith.constant 0 : index
    %217 = vector.load %arg14[%c0_144, %c0_145] : memref<8x1xf32, #tpu.memory_space<vmem>>, vector<8x1xf32>
    %218 = vector.extract_strided_slice %215 {offsets = [0, 0], sizes = [8, 128], strides = [1, 1]} : vector<8x256xf32> to vector<8x128xf32>
    %219 = vector.broadcast %1 : vector<1x128xf32> to vector<8x128xf32>
    %220 = arith.mulf %218, %219 : vector<8x128xf32>
    %cst_146 = arith.constant dense<0.000000e+00> : vector<8xf32>
    %221 = vector.multi_reduction <add>, %220, %cst_146 [1] : vector<8x128xf32> to vector<8xf32>
    %222 = vector.shape_cast %221 : vector<8xf32> to vector<8x1xf32>
    %cst_147 = arith.constant 1.562500e-02 : f32
    %223 = vector.broadcast %cst_147 : f32 to vector<8x1xf32>
    %224 = arith.mulf %222, %223 : vector<8x1xf32>
    %225 = vector.broadcast %224 : vector<8x1xf32> to vector<8x128xf32>
    %226 = arith.subf %218, %225 : vector<8x128xf32>
    %227 = arith.mulf %226, %226 : vector<8x128xf32>
    %228 = vector.broadcast %1 : vector<1x128xf32> to vector<8x128xf32>
    %229 = arith.mulf %227, %228 : vector<8x128xf32>
    %cst_148 = arith.constant dense<0.000000e+00> : vector<8xf32>
    %230 = vector.multi_reduction <add>, %229, %cst_148 [1] : vector<8x128xf32> to vector<8xf32>
    %231 = vector.shape_cast %230 : vector<8xf32> to vector<8x1xf32>
    %cst_149 = arith.constant 1.562500e-02 : f32
    %232 = vector.broadcast %cst_149 : f32 to vector<8x1xf32>
    %233 = arith.mulf %231, %232 : vector<8x1xf32>
    %cst_150 = arith.constant 9.99999974E-6 : f32
    %234 = vector.broadcast %cst_150 : f32 to vector<8x1xf32>
    %235 = arith.addf %233, %234 : vector<8x1xf32>
    %236 = math.rsqrt %235 : vector<8x1xf32>
    %237 = vector.broadcast %236 : vector<8x1xf32> to vector<8x128xf32>
    %238 = arith.mulf %226, %237 : vector<8x128xf32>
    %239 = vector.extract_strided_slice %215 {offsets = [0, 128], sizes = [8, 128], strides = [1, 1]} : vector<8x256xf32> to vector<8x128xf32>
    %240 = vector.broadcast %1 : vector<1x128xf32> to vector<8x128xf32>
    %241 = arith.mulf %239, %240 : vector<8x128xf32>
    %cst_151 = arith.constant dense<0.000000e+00> : vector<8xf32>
    %242 = vector.multi_reduction <add>, %241, %cst_151 [1] : vector<8x128xf32> to vector<8xf32>
    %243 = vector.shape_cast %242 : vector<8xf32> to vector<8x1xf32>
    %cst_152 = arith.constant 1.562500e-02 : f32
    %244 = vector.broadcast %cst_152 : f32 to vector<8x1xf32>
    %245 = arith.mulf %243, %244 : vector<8x1xf32>
    %246 = vector.broadcast %245 : vector<8x1xf32> to vector<8x128xf32>
    %247 = arith.subf %239, %246 : vector<8x128xf32>
    %248 = arith.mulf %247, %247 : vector<8x128xf32>
    %249 = vector.broadcast %1 : vector<1x128xf32> to vector<8x128xf32>
    %250 = arith.mulf %248, %249 : vector<8x128xf32>
    %cst_153 = arith.constant dense<0.000000e+00> : vector<8xf32>
    %251 = vector.multi_reduction <add>, %250, %cst_153 [1] : vector<8x128xf32> to vector<8xf32>
    %252 = vector.shape_cast %251 : vector<8xf32> to vector<8x1xf32>
    %cst_154 = arith.constant 1.562500e-02 : f32
    %253 = vector.broadcast %cst_154 : f32 to vector<8x1xf32>
    %254 = arith.mulf %252, %253 : vector<8x1xf32>
    %cst_155 = arith.constant 9.99999974E-6 : f32
    %255 = vector.broadcast %cst_155 : f32 to vector<8x1xf32>
    %256 = arith.addf %254, %255 : vector<8x1xf32>
    %257 = math.rsqrt %256 : vector<8x1xf32>
    %258 = vector.broadcast %257 : vector<8x1xf32> to vector<8x128xf32>
    %259 = arith.mulf %247, %258 : vector<8x128xf32>
    %260 = tpu.concatenate %238, %259 in 1 : vector<8x128xf32>, vector<8x128xf32> -> vector<8x256xf32>
    %261 = vector.broadcast %216 : vector<8x1xf32> to vector<8x256xf32>
    %262 = arith.mulf %260, %261 : vector<8x256xf32>
    %263 = vector.broadcast %217 : vector<8x1xf32> to vector<8x256xf32>
    %264 = arith.addf %262, %263 : vector<8x256xf32>
    %265 = arith.addf %209, %264 : vector<8x256xf32>
    %cst_156 = arith.constant 0.000000e+00 : f32
    %266 = vector.broadcast %cst_156 : f32 to vector<8x256xf32>
    %267 = arith.cmpf oge, %265, %266 : vector<8x256xf32>
    %cst_157 = arith.constant 0.00999999977 : f32
    %268 = vector.broadcast %cst_157 : f32 to vector<8x256xf32>
    %269 = arith.mulf %268, %265 : vector<8x256xf32>
    %270 = arith.select %267, %265, %269 : vector<8x256xi1>, vector<8x256xf32>
    %c0_158 = arith.constant 0 : index
    %c0_159 = arith.constant 0 : index
    %271 = vector.load %arg15[%c0_158, %c0_159] : memref<8x256xf32, #tpu.memory_space<vmem>>, vector<8x256xf32>
    tpu.vector_store %arg15[%c0_158, %c0_159], %270 {strides = array<i32>} : memref<8x256xf32, #tpu.memory_space<vmem>>, vector<8x256xf32>,
    return
  }
  func.func @transform_0(%arg0: i32) -> (i32, i32) {
    %c0_i32 = arith.constant 0 : i32
    %c0_i32_0 = arith.constant 0 : i32
    return %arg0, %c0_i32 : i32, i32
  }
  func.func @transform_1(%arg0: i32) -> (i32, i32) {
    %c0_i32 = arith.constant 0 : i32
    %c0_i32_0 = arith.constant 0 : i32
    %c0_i32_1 = arith.constant 0 : i32
    return %c0_i32, %c0_i32_0 : i32, i32
  }
  func.func @transform_2(%arg0: i32) -> (i32, i32, i32) {
    %c0_i32 = arith.constant 0 : i32
    %c0_i32_0 = arith.constant 0 : i32
    %c0_i32_1 = arith.constant 0 : i32
    %c0_i32_2 = arith.constant 0 : i32
    return %c0_i32, %c0_i32_0, %c0_i32_1 : i32, i32, i32
  }
  func.func @transform_3(%arg0: i32) -> (i32, i32) {
    %c0_i32 = arith.constant 0 : i32
    %c0_i32_0 = arith.constant 0 : i32
    %c0_i32_1 = arith.constant 0 : i32
    return %c0_i32, %c0_i32_0 : i32, i32
  }
  func.func @transform_4(%arg0: i32) -> (i32, i32) {
    %c0_i32 = arith.constant 0 : i32
    %c0_i32_0 = arith.constant 0 : i32
    %c0_i32_1 = arith.constant 0 : i32
    return %c0_i32, %c0_i32_0 : i32, i32
  }
  func.func @transform_5(%arg0: i32) -> (i32, i32) {
    %c0_i32 = arith.constant 0 : i32
    %c0_i32_0 = arith.constant 0 : i32
    %c0_i32_1 = arith.constant 0 : i32
    return %c0_i32, %c0_i32_0 : i32, i32
  }
  func.func @transform_6(%arg0: i32) -> (i32, i32, i32) {
    %c0_i32 = arith.constant 0 : i32
    %c0_i32_0 = arith.constant 0 : i32
    %c0_i32_1 = arith.constant 0 : i32
    %c0_i32_2 = arith.constant 0 : i32
    return %c0_i32, %c0_i32_0, %c0_i32_1 : i32, i32, i32
  }
  func.func @transform_7(%arg0: i32) -> (i32, i32) {
    %c0_i32 = arith.constant 0 : i32
    %c0_i32_0 = arith.constant 0 : i32
    %c0_i32_1 = arith.constant 0 : i32
    return %c0_i32, %c0_i32_0 : i32, i32
  }
  func.func @transform_8(%arg0: i32) -> (i32, i32) {
    %c0_i32 = arith.constant 0 : i32
    %c0_i32_0 = arith.constant 0 : i32
    %c0_i32_1 = arith.constant 0 : i32
    return %c0_i32, %c0_i32_0 : i32, i32
  }
  func.func @transform_9(%arg0: i32) -> (i32, i32) {
    %c0_i32 = arith.constant 0 : i32
    %c0_i32_0 = arith.constant 0 : i32
    %c0_i32_1 = arith.constant 0 : i32
    return %c0_i32, %c0_i32_0 : i32, i32
  }
  func.func @transform_10(%arg0: i32) -> (i32, i32) {
    %c0_i32 = arith.constant 0 : i32
    %c0_i32_0 = arith.constant 0 : i32
    %c0_i32_1 = arith.constant 0 : i32
    return %c0_i32, %c0_i32_0 : i32, i32
  }
  func.func @transform_11(%arg0: i32) -> (i32, i32) {
    %c0_i32 = arith.constant 0 : i32
    %c0_i32_0 = arith.constant 0 : i32
    %c0_i32_1 = arith.constant 0 : i32
    return %c0_i32, %c0_i32_0 : i32, i32
  }
  func.func @transform_12(%arg0: i32) -> (i32, i32) {
    %c0_i32 = arith.constant 0 : i32
    %c0_i32_0 = arith.constant 0 : i32
    %c0_i32_1 = arith.constant 0 : i32
    return %c0_i32, %c0_i32_0 : i32, i32
  }
  func.func @transform_13(%arg0: i32) -> (i32, i32) {
    %c0_i32 = arith.constant 0 : i32
    %c0_i32_0 = arith.constant 0 : i32
    %c0_i32_1 = arith.constant 0 : i32
    return %c0_i32, %c0_i32_0 : i32, i32
  }
  func.func @transform_14(%arg0: i32) -> (i32, i32) {
    %c0_i32 = arith.constant 0 : i32
    %c0_i32_0 = arith.constant 0 : i32
    return %arg0, %c0_i32 : i32, i32
  }
}

</mosaic_0001>

<bundles_post_ra>
// kernel: tpu_custom_call.1
= control target key start
LH: loop header
LB: loop body
LE: loop exit
PB: predicated region body
PF: predicated region fallthrough
CT: control target
= control target key end

     0   :  { %s1984_s17 = smov 127   ;;  %v1985_v5 = vmov 0.0   ;;  %vm56_vm0 = vcmask 64512   ;;  %s2312_s0 = inlined_call_operand.vmem [shape: f32[32,384], index: 0, kind: input, shape index: {}]   ;;  %s2313_s1 = inlined_call_operand.vmem [shape: f32[1,256], index: 1, kind: input, shape index: {}]   ;;  %s2314_s2 = inlined_call_operand.vmem [shape: f32[9,8,8], index: 2, kind: input, shape index: {}]   ;;  %s2315_s3 = inlined_call_operand.vmem [shape: f32[8,1], index: 3, kind: input, shape index: {}]   ;;  %s2316_s4 = inlined_call_operand.vmem [shape: f32[8,1], index: 4, kind: input, shape index: {}]   ;;  %s2317_s5 = inlined_call_operand.vmem [shape: f32[8,1], index: 5, kind: input, shape index: {}]   ;;  %s2318_s6 = inlined_call_operand.vmem [shape: f32[9,8,8], index: 6, kind: input, shape index: {}]   ;;  %s2319_s7 = inlined_call_operand.vmem [shape: f32[8,1], index: 7, kind: input, shape index: {}]   ;;  %s2320_s8 = inlined_call_operand.vmem [shape: f32[8,1], index: 8, kind: input, shape index: {}]   ;;  %s2321_s9 = inlined_call_operand.vmem [shape: f32[8,1], index: 9, kind: input, shape index: {}]   ;;  %s2322_s10 = inlined_call_operand.vmem [shape: f32[8,8], index: 10, kind: input, shape index: {}]   ;;  %s2323_s11 = inlined_call_operand.vmem [shape: f32[8,1], index: 11, kind: input, shape index: {}]   ;;  %s2324_s12 = inlined_call_operand.vmem [shape: f32[8,1], index: 12, kind: input, shape index: {}]   ;;  %s2325_s13 = inlined_call_operand.vmem [shape: f32[8,1], index: 13, kind: input, shape index: {}]   ;;  %s2326_s14 = inlined_call_operand.hbm [shape: f32[8,256], index: 14, kind: output, shape index: {}]  }
   0x1   :  { %v206_v0 = vld [vmem:[%s2312_s0 + $0x8] sm:$0xff]  ;;  %v205_v1 = vld [vmem:[%s2312_s0] sm:$0xff]  ;;  %v207_v2 = vld [vmem:[%s2312_s0 + $0x10] sm:$0xff]  ;;  %124 = vmatprep.mubr.f32.mxu0 %v1985_v5  ;;  %198 = vmatprep.mubr.f32.mxu1 %v1985_v5 }
   0x2   :  { %215 = vrot.lane.b32.xlu0 %v206_v0, %s1984_s17  ;;  %213 = vrot.lane.b32.xlu1 %v205_v1, %s1984_s17  ;;  %v461_v3 = vld [vmem:[%s2312_s0 + $0x38] sm:$0xff]  ;;  %v644_v4 = vld [vmem:[%s2312_s0 + $0x20] sm:$0xff] }
   0x3   :  { %164 = vmatprep.subr.mxu1 %v206_v0  ;;  %v643_v6 = vld [vmem:[%s2312_s0 + $0x18] sm:$0xff]  ;;  %90 = vmatprep.subr.mxu0 %v644_v4  ;;  %v1901_v7 = vld [vmem:[%s2314_s2 + $0x8] sm:$0xff]  ;;  %v51_v8 = vld [vmem:[%s2314_s2] sm:$0xff] }
   0x4   :  { %165 = vmatpush1.msra.mxu1 %v205_v1  ;;  %91 = vmatpush1.msra.mxu0 %v643_v6  ;;  %v462_v9 = vld [vmem:[%s2312_s0 + $0x40] sm:$0xff]  ;;  %v460_v10 = vld [vmem:[%s2312_s0 + $0x30] sm:$0xff] }
   0x5   :  { %1902 = vmatmul.mubr.msk.f32.vlgmr.msra.gmra.mxu0 %vm56_vm0, %v1901_v7  ;;  %1903 = vmatmul.mubr.msk.f32.vlgmr.msra.gmra.mxu1 %vm56_vm0, %v51_v8 }
   0x6   :  { %217 = vrot.lane.b32.xlu0 %v207_v2, %s1984_s17  ;;  %470 = vrot.lane.b32.xlu1 %v461_v3, %s1984_s17 }
   0x7   :  { %19 = vsyncpa [#allocation4], 0  ;;  %337 = vmatprep.subr.mxu1 %v461_v3  ;;  %371 = vmatprep.mubr.f32.mxu1 %v1985_v5  ;;  %v1906_v11 = vld [vmem:[%s2314_s2 + $0x18] sm:$0xff]  ;;  %s1986_s21 = smov 118   ;;  %v645_v12 = vld [vmem:[%s2312_s0 + $0x28] sm:$0xff]  ;;  %v1987_v13 = vmov 0   ;;  %v837_v3 = vlaneseq }
   0x8   :  { %338 = vmatpush1.msra.mxu1 %v460_v10  ;;  %291 = vmatprep.mubr.f32.mxu0 %v1985_v5  ;;  %s1988_s24 = smov 117   ;;  %v826_v14 = vld [vmem:[%s2315_s3] sm:$0xff]  ;;  %vm219_vm1 = vcmask 1039360   ;;  %v2137_v20 = vld [vmem:[%s2312_s0 + $0x50] sm:$0xff]  ;;  %v2146_v23 = vld [vmem:[%s2312_s0 + $0x48] sm:$0xff]  ;;  %vm562_vm2 = vcmask 965632  }
   0x9   :  { %1907 = vmatmul.mubr.msk.f32.vlgmr.msra.gmra.mxu1 %vm56_vm0, %v1906_v11  ;;  %1948 = vset.pattern.permute.xlu1 %v1987_v13  ;;  %v1904_v21 = vld [vmem:[%s2314_s2 + $0x10] sm:$0xff]  ;;  %v1908_v28 = vld [vmem:[%s2314_s2 + $0x20] sm:$0xff]  ;;  %v1910_v29 = vld [vmem:[%s2314_s2 + $0x28] sm:$0xff]  ;;  %vm745_vm3 = vcmask 957440   ;;  %vm895_vm4 = vcmask 89088   ;;  %vm897_vm5 = vcmask 1047640  }
   0xa   :  { %472 = vrot.lane.b32.xlu0 %v462_v9, %s1984_s17  ;;  %468 = vrot.lane.b32.xlu1 %v460_v10, %s1984_s17  ;;  %v1912_v35 = vld [vmem:[%s2314_s2 + $0x30] sm:$0xff]  ;;  %v1914_v41 = vld [vmem:[%s2314_s2 + $0x38] sm:$0xff]  ;;  %v2185_v9 = vshrl.u32 %v837_v3, 7  ;;  %896 = vst.msk [vmem:[#allocation2] sm:$0xff] %vm895_vm4, %v1985_v5  ;;  %s1991_s15 = smov 126   ;;  %s1992_s16 = smov 107  }
   0xb   :  { %545 = vmatprep.mubr.f32.mxu1 %v1985_v5  ;;  %1949 = vset.pattern.permute.xlu0 %v1987_v13  ;;  %v1916_v46 = vld [vmem:[%s2314_s2 + $0x40] sm:$0xff]  ;;  %898 = vst.msk [vmem:[#allocation2 + $0x10] sm:$0xff] %vm897_vm5, %v1985_v5  ;;  %s1993_s19 = smov 108   ;;  %s1994_s20 = smov 106   ;;  %vm1354_vm8 = vcmask 949248   ;;  %vm1532_vm9 = vcmask 875520  }
   0xc   :  { %vm1089_vm10 = vcmask 1031168   ;;  %vm1443_vm11 = vcmask 883712   ;;  %vm1621_vm12 = vcmask 867328  }
   0xe   :  { %558 = vrot.lane.b32.xlu0 %v206_v0, %s1986_s21  ;;  %560 = vrot.lane.b32.xlu1 %v207_v2, %s1986_s21 }
  0x12   :  { %556 = vrot.lane.b32.xlu0 %v205_v1, %s1986_s21  ;;  %653 = vrot.lane.b32.xlu1 %v644_v4, %s1986_s21 }
  0x16   :  { %655 = vrot.lane.b32.xlu0 %v645_v12, %s1986_s21  ;;  %651 = vrot.lane.b32.xlu1 %v643_v6, %s1986_s21 }
  0x1a   :  { %741 = vrot.lane.b32.xlu0 %v206_v0, %s1988_s24  ;;  %743 = vrot.lane.b32.xlu1 %v207_v2, %s1988_s24 }
  0x1e   :  { %739 = vrot.lane.b32.xlu0 %v205_v1, %s1988_s24  ;;  %829 = vperm.xlu1 %1948, %v826_v14   ;;  %v839_v14 = vsub.s32 0, %v2185_v9 }
  0x74   :  { %v216_v15 = vpop.permute.xlu0 %215  ;;  %v214_v16 = vpop.permute.xlu1 %213 }
  0x75   :  { %v220_v22 = vsel %vm219_vm1, %v214_v16, %v216_v15  ;;  %v48_v16 = vld [vmem:[%s2313_s1] sm:$0x3] }
  0x78   :  { %v218_v17 = vpop.permute.xlu0 %217  ;;  %v471_v18 = vpop.permute.xlu1 %470 }
  0x79   :  { %v221_v19 = vsel %vm219_vm1, %v216_v15, %v218_v17 }
  0x7a   :  { %257 = vmatprep.subr.mxu0 %v221_v19 }
  0x7b   :  { %258 = vmatpush1.msra.mxu0 %v220_v22 }
  0x7c   :  { %v473_v24 = vpop.permute.xlu0 %472  ;;  %v469_v25 = vpop.permute.xlu1 %468  ;;  %417 = vmatprep.subr.mxu0 %v2137_v20  ;;  %1905 = vmatmul.mubr.msk.f32.vlgmr.msra.gmra.mxu0 %vm56_vm0, %v1904_v21 }
  0x7d   :  { %v474_v26 = vsel %vm219_vm1, %v469_v25, %v471_v18  ;;  %v475_v27 = vsel %vm219_vm1, %v471_v18, %v473_v24  ;;  %418 = vmatpush1.msra.mxu0 %v2146_v23  ;;  %451 = vmatprep.mubr.f32.mxu0 %v1985_v5  ;;  %v2191_v24 = vrot.slane %v48_v16, %v839_v14 }
  0x7e   :  { %511 = vmatprep.subr.mxu1 %v475_v27 }
  0x7f   :  { %512 = vmatpush1.msra.mxu1 %v474_v26 }
  0x80   :  { %v559_v30 = vpop.permute.xlu0 %558  ;;  %v561_v31 = vpop.permute.xlu1 %560  ;;  %1909 = vmatmul.mubr.msk.f32.vlgmr.msra.gmra.mxu0 %vm56_vm0, %v1908_v28  ;;  %1911 = vmatmul.mubr.msk.f32.vlgmr.msra.gmra.mxu1 %vm56_vm0, %v1910_v29 }
  0x81   :  { %v564_v32 = vsel %vm562_vm2, %v559_v30, %v561_v31  ;;  %634 = vmatprep.mubr.f32.mxu0 %v1985_v5  ;;  %728 = vmatprep.mubr.f32.mxu1 %v1985_v5  ;;  %v834_v31 = vld [vmem:[%s2316_s4] sm:$0xff]  ;;  %s1989_s4 = smov 11  }
  0x82   :  { %600 = vmatprep.subr.mxu0 %v564_v32 }
  0x84   :  { %v557_v33 = vpop.permute.xlu0 %556  ;;  %v654_v34 = vpop.permute.xlu1 %653 }
  0x85   :  { %v563_v36 = vsel %vm562_vm2, %v557_v33, %v559_v30 }
  0x86   :  { %601 = vmatpush1.msra.mxu0 %v563_v36 }
  0x87   :  { %1913 = vmatmul.mubr.msk.f32.vlgmr.msra.gmra.mxu0 %vm56_vm0, %v1912_v35 }
  0x88   :  { %v656_v37 = vpop.permute.xlu0 %655  ;;  %v652_v38 = vpop.permute.xlu1 %651  ;;  %817 = vmatprep.mubr.f32.mxu0 %v1985_v5 }
  0x89   :  { %v657_v39 = vsel %vm562_vm2, %v652_v38, %v654_v34  ;;  %v658_v40 = vsel %vm562_vm2, %v654_v34, %v656_v37 }
  0x8a   :  { %694 = vmatprep.subr.mxu1 %v658_v40 }
  0x8b   :  { %695 = vmatpush1.msra.mxu1 %v657_v39 }
  0x8c   :  { %v742_v42 = vpop.permute.xlu0 %741  ;;  %v744_v43 = vpop.permute.xlu1 %743  ;;  %1915 = vmatmul.mubr.msk.f32.vlgmr.msra.gmra.mxu1 %vm56_vm0, %v1914_v41 }
  0x8d   :  { %v747_v44 = vsel %vm745_vm3, %v742_v42, %v744_v43  ;;  %1000 = vmatprep.mubr.f32.mxu1 %v1985_v5 }
  0x8e   :  { %783 = vmatprep.subr.mxu0 %v747_v44 }
  0x90   :  { %v740_v45 = vpop.permute.xlu0 %739 }
  0x91   :  { %v746_v47 = vsel %vm745_vm3, %v740_v45, %v742_v42  ;;  %v835_v42 = vld [vmem:[%s2317_s5] sm:$0xff]  ;;  %s1990_s5 = smov 116  }
  0x92   :  { %784 = vmatpush1.msra.mxu0 %v746_v47 }
  0x93   :  { %1917 = vmatmul.mubr.msk.f32.vlgmr.msra.gmra.mxu0 %vm56_vm0, %v1916_v46 }
  0x94   :  { %1074 = vmatprep.mubr.f32.mxu0 %v1985_v5 }
  0x99   :  { %v830_v19 = vpop.permute.xlu1 %829 }
  0xc5   :  { %v126_v48 = vpop.f32.mrf.mxu0  ;;  %v200_v49 = vpop.f32.mrf.mxu1 }
  0xc6   :  { %v201_v52 = vadd.f32 %v200_v49, %v126_v48 }
  0xc7   :  { %v128_v50 = vpop.f32.mrf.mxu0  ;;  %v202_v51 = vpop.f32.mrf.mxu1 }
  0xc8   :  { %v203_v53 = vadd.f32 %v202_v51, %v128_v50 }
  0xc9   :  { %v373_v55 = vpop.f32.mrf.mxu1 }
  0xcb   :  { %v375_v59 = vpop.f32.mrf.mxu1 }
 0x13c   :  { %v293_v54 = vpop.f32.mrf.mxu0 }
 0x13d   :  { %v298_v56 = vadd.f32 %v293_v54, %v201_v52 }
 0x13e   :  { %v295_v57 = vpop.f32.mrf.mxu0 }
 0x13f   :  { %v299_v58 = vadd.f32 %v295_v57, %v203_v53  ;;  %v378_v61 = vadd.f32 %v373_v55, %v298_v56  ;;  %v890_v57 = vsub.s32 1, %v2185_v9 }
 0x140   :  { %v453_v60 = vpop.f32.mrf.mxu0  ;;  %v547_v0 = vpop.f32.mrf.mxu1 }
 0x141   :  { %v379_v62 = vadd.f32 %v375_v59, %v299_v58  ;;  %v458_v1 = vadd.f32 %v453_v60, %v378_v61 }
 0x142   :  { %v455_v63 = vpop.f32.mrf.mxu0  ;;  %v549_v4 = vpop.f32.mrf.mxu1 }
 0x143   :  { %v459_v2 = vadd.f32 %v455_v63, %v379_v62  ;;  %v552_v7 = vadd.f32 %v547_v0, %v458_v1  ;;  %v891_v63 = vrot.slane %v48_v16, %v890_v57 }
 0x145   :  { %v553_v8 = vadd.f32 %v549_v4, %v459_v2 }
 0x147   :  { %v636_v6 = vpop.f32.mrf.mxu0 }
 0x148   :  { %v641_v12 = vadd.f32 %v636_v6, %v552_v7 }
 0x149   :  { %v638_v10 = vpop.f32.mrf.mxu0 }
 0x14a   :  { %v642_v13 = vadd.f32 %v638_v10, %v553_v8  ;;  %v914_v8 = vld [vmem:[%s2318_s6] sm:$0xff] }
 0x14b   :  { %v1702_v10 = vld [vmem:[%s2319_s7] sm:$0xff] }
 0x14c   :  { %v730_v11 = vpop.f32.mrf.mxu1 }
 0x14d   :  { %v735_v17 = vadd.f32 %v730_v11, %v641_v12  ;;  %v1755_v11 = vld [vmem:[%s2323_s11] sm:$0xff] }
 0x14e   :  { %v732_v15 = vpop.f32.mrf.mxu1 }
 0x14f   :  { %v736_v21 = vadd.f32 %v732_v15, %v642_v13 }
 0x153   :  { %v819_v18 = vpop.f32.mrf.mxu0 }
 0x154   :  { %v824_v22 = vadd.f32 %v819_v18, %v735_v17 }
 0x155   :  { %v821_v25 = vpop.f32.mrf.mxu0 }
 0x156   :  { %v832_v26 = vadd.f32 %v830_v19, %v824_v22  ;;  %v825_v27 = vadd.f32 %v821_v25, %v736_v21 }
 0x158   :  { %v833_v28 = vadd.f32 %v830_v19, %v825_v27  ;;  %v842_v29 = vmul.f32 %v2191_v24, %v832_v26 }
 0x15a   :  { %843 = vadd.xlane.f32.xlu0 %v842_v29  ;;  %v855_v30 = vmul.f32 %v2191_v24, %v833_v28 }
 0x15c   :  { %856 = vadd.xlane.f32.xlu1 %v855_v30  ;;  %v1923_v30 = vld [vmem:[%s2318_s6 + $0x18] sm:$0xff] }
 0x16d   :  { %870 = vperm.xlu1 %1948, %v834_v31  }
 0x1e3   :  { %v844_v32 = vpop.xlane.xlu0 %843 }
 0x1e4   :  { %v845_v33 = vmul.f32 0.015625, %v844_v32 }
 0x1e5   :  { %v857_v34 = vpop.xlane.xlu1 %856 }
 0x1e6   :  { %v846_v35 = vsub.f32 %v832_v26, %v845_v33  ;;  %v858_v36 = vmul.f32 0.015625, %v857_v34  ;;  %v1927_v34 = vld [vmem:[%s2318_s6 + $0x28] sm:$0xff] }
 0x1e8   :  { %v859_v37 = vsub.f32 %v833_v28, %v858_v36  ;;  %v847_v38 = vmul.f32 %v846_v35, %v846_v35 }
 0x1e9   :  { %v871_v51 = vpop.permute.xlu1 %870 }
 0x1ea   :  { %v848_v39 = vmul.f32 %v847_v38, %v2191_v24  ;;  %v860_v40 = vmul.f32 %v859_v37, %v859_v37 }
 0x1ec   :  { %849 = vadd.xlane.f32.xlu0 %v848_v39  ;;  %v861_v41 = vmul.f32 %v860_v40, %v2191_v24  ;;  %v1931_v39 = vld [vmem:[%s2318_s6 + $0x38] sm:$0xff] }
 0x1f0   :  { %862 = vadd.xlane.f32.xlu0 %v861_v41 }
 0x206   :  { %877 = vperm.xlu0 %1949, %v835_v42  }
 0x275   :  { %v850_v43 = vpop.xlane.xlu0 %849 }
 0x276   :  { %v851_v44 = vmul.f32 0.015625, %v850_v43 }
 0x278   :  { %v852_v45 = vadd.f32 1e-05, %v851_v44  ;;  %v1754_v44 = vld [vmem:[%s2322_s10] sm:$0xff] }
 0x279   :  { %v863_v46 = vpop.xlane.xlu0 %862 }
 0x27a   :  { %1950 = vrsqrt.f32 %v852_v45  ;;  %v864_v47 = vmul.f32 0.015625, %v863_v46  ;;  %v1918_v45 = vld [vmem:[%s2318_s6 + $0x8] sm:$0xff] }
 0x27c   :  { %v865_v48 = vadd.f32 1e-05, %v864_v47  ;;  %v1921_v47 = vld [vmem:[%s2318_s6 + $0x10] sm:$0xff] }
 0x27e   :  { %1952 = vrsqrt.f32 %v865_v48 }
 0x281   :  { %v878_v52 = vpop.permute.xlu0 %877 }
 0x287   :  { %v1951_v49 = vpop.eup %1950 }
 0x288   :  { %v854_v50 = vmul.f32 %v1951_v49, %v846_v35 }
 0x28a   :  { %v873_v53 = vmul.f32 %v871_v51, %v854_v50 }
 0x28b   :  { %v1953_v54 = vpop.eup %1952 }
 0x28c   :  { %v867_v55 = vmul.f32 %v1953_v54, %v859_v37  ;;  %v880_v56 = vadd.f32 %v878_v52, %v873_v53 }
 0x28e   :  { %v874_v58 = vmul.f32 %v871_v51, %v867_v55  ;;  %vm882_vm6 = vcmp.ge.f32.partialorder %v880_v56, 0.0  ;;  %v884_v59 = vmul.f32 0.01, %v880_v56  ;;  %v1925_v51 = vld [vmem:[%s2318_s6 + $0x20] sm:$0xff]  ;;  %v1929_v55 = vld [vmem:[%s2318_s6 + $0x30] sm:$0xff] }
 0x290   :  { %v881_v60 = vadd.f32 %v878_v52, %v874_v58  ;;  %v886_v61 = vsel %vm882_vm6, %v880_v56, %v884_v59 }
 0x291   :  { %v893_v62 = vmul.f32 %v886_v61, %v2191_v24 }
 0x292   :  { %vm883_vm7 = vcmp.ge.f32.partialorder %v881_v60, 0.0  ;;  %v885_v0 = vmul.f32 0.01, %v881_v60 }
 0x293   :  { %901 = vrot.lane.b32.xlu1 %v893_v62, %s1989_s4 }
 0x294   :  { %v887_v1 = vsel %vm883_vm7, %v881_v60, %v885_v0  ;;  %v1933_v60 = vld [vmem:[%s2318_s6 + $0x40] sm:$0xff] }
 0x295   :  { %v894_v2 = vmul.f32 %v891_v63, %v887_v1 }
 0x297   :  { %903 = vrot.lane.b32.xlu1 %v894_v2, %s1989_s4 }
 0x305   :  { %v902_v3 = vpop.permute.xlu1 %901 }
 0x306   :  { %909 = vst.msk [vmem:[#allocation2] sm:$0xff] %vm897_vm5, %v902_v3 }
 0x309   :  { %v904_v4 = vpop.permute.xlu1 %903 }
 0x30a   :  { %v905_v6 = vsel %vm895_vm4, %v902_v3, %v904_v4  ;;  %911 = vst.msk [vmem:[#allocation2 + $0x10] sm:$0xff] %vm895_vm4, %v904_v4 }
 0x30b   :  { %1040 = vmatprep.subr.mxu0 %v905_v6 }
 0x30d   :  { %v915_v7 = vld [vmem:[#allocation2] sm:$0xff] }
 0x30e   :  { %1172 = vrot.lane.b32.xlu0 %v915_v7, %s1986_s21  ;;  %923 = vrot.lane.b32.xlu1 %v915_v7, %s1984_s17 }
 0x30f   :  { %1041 = vmatpush1.msra.mxu0 %v915_v7 }
 0x310   :  { %1920 = vmatmul.mubr.msk.f32.vlgmr.msra.gmra.mxu0 %vm56_vm0, %v914_v8 }
 0x311   :  { %v917_v9 = vld [vmem:[#allocation2 + $0x10] sm:$0xff]  ;;  %1249 = vmatprep.mubr.f32.mxu0 %v1985_v5 }
 0x312   :  { %1348 = vrot.lane.b32.xlu0 %v915_v7, %s1990_s5  ;;  %1083 = vrot.lane.b32.xlu1 %v915_v7, %s1991_s15 }
 0x316   :  { %1526 = vrot.lane.b32.xlu0 %v915_v7, %s1992_s16  ;;  %1260 = vrot.lane.b32.xlu1 %v915_v7, %s1988_s24 }
 0x31a   :  { %1437 = vrot.lane.b32.xlu1 %v915_v7, %s1993_s19  ;;  %1264 = vrot.lane.b32.xlu0 %v917_v9, %s1988_s24 }
 0x31e   :  { %1441 = vrot.lane.b32.xlu0 %v917_v9, %s1993_s19  ;;  %927 = vrot.lane.b32.xlu1 %v917_v9, %s1984_s17 }
 0x322   :  { %1087 = vrot.lane.b32.xlu1 %v917_v9, %s1991_s15  ;;  %1174 = vrot.lane.b32.xlu0 %v905_v6, %s1986_s21 }
 0x326   :  { %1176 = vrot.lane.b32.xlu1 %v917_v9, %s1986_s21  ;;  %1350 = vrot.lane.b32.xlu0 %v905_v6, %s1990_s5 }
 0x32a   :  { %1352 = vrot.lane.b32.xlu1 %v917_v9, %s1990_s5  ;;  %1528 = vrot.lane.b32.xlu0 %v905_v6, %s1992_s16 }
 0x32e   :  { %1530 = vrot.lane.b32.xlu1 %v917_v9, %s1992_s16  ;;  %1619 = vrot.lane.b32.xlu0 %v917_v9, %s1994_s20 }
 0x332   :  { %1705 = vperm.xlu0 %1949, %v1702_v10   ;;  %925 = vrot.lane.b32.xlu1 %v905_v6, %s1984_s17 }
 0x336   :  { %1085 = vrot.lane.b32.xlu1 %v905_v6, %s1991_s15 }
 0x33a   :  { %1262 = vrot.lane.b32.xlu1 %v905_v6, %s1988_s24 }
 0x33e   :  { %1439 = vrot.lane.b32.xlu1 %v905_v6, %s1993_s19 }
 0x342   :  { %1617 = vrot.lane.b32.xlu1 %v905_v6, %s1994_s20 }
 0x346   :  { %1615 = vrot.lane.b32.xlu1 %v915_v7, %s1994_s20 }
 0x34a   :  { %1758 = vperm.xlu1 %1948, %v1755_v11  }
 0x380   :  { %v1173_v12 = vpop.permute.xlu0 %1172  ;;  %v924_v13 = vpop.permute.xlu1 %923 }
 0x384   :  { %v1349_v14 = vpop.permute.xlu0 %1348  ;;  %v1084_v15 = vpop.permute.xlu1 %1083 }
 0x388   :  { %v1527_v16 = vpop.permute.xlu0 %1526  ;;  %v1261_v17 = vpop.permute.xlu1 %1260 }
 0x38c   :  { %v1265_v18 = vpop.permute.xlu0 %1264  ;;  %v2232_v19 = vpop.permute.xlu1 %1437 }
 0x390   :  { %v2234_v21 = vpop.permute.xlu0 %1441  ;;  %v928_v22 = vpop.permute.xlu1 %927 }
 0x394   :  { %v1175_v25 = vpop.permute.xlu0 %1174  ;;  %v1088_v26 = vpop.permute.xlu1 %1087 }
 0x395   :  { %v1178_v31 = vsel %vm562_vm2, %v1173_v12, %v1175_v25 }
 0x398   :  { %v1177_v27 = vpop.permute.xlu1 %1176  ;;  %v1351_v28 = vpop.permute.xlu0 %1350 }
 0x399   :  { %v1179_v29 = vsel %vm562_vm2, %v1175_v25, %v1177_v27  ;;  %v1355_v35 = vsel %vm1354_vm8, %v1349_v14, %v1351_v28 }
 0x39a   :  { %1215 = vmatprep.subr.mxu0 %v1179_v29 }
 0x39b   :  { %1216 = vmatpush1.msra.mxu0 %v1178_v31 }
 0x39c   :  { %1924 = vmatmul.mubr.msk.f32.vlgmr.msra.gmra.mxu0 %vm56_vm0, %v1923_v30  ;;  %v1353_v32 = vpop.permute.xlu1 %1352  ;;  %v1529_v36 = vpop.permute.xlu0 %1528 }
 0x39d   :  { %v1356_v33 = vsel %vm1354_vm8, %v1351_v28, %v1353_v32  ;;  %1426 = vmatprep.mubr.f32.mxu0 %v1985_v5  ;;  %v1533_v40 = vsel %vm1532_vm9, %v1527_v16, %v1529_v36 }
 0x39e   :  { %1392 = vmatprep.subr.mxu0 %v1356_v33 }
 0x39f   :  { %1393 = vmatpush1.msra.mxu0 %v1355_v35 }
 0x3a0   :  { %1928 = vmatmul.mubr.msk.f32.vlgmr.msra.gmra.mxu0 %vm56_vm0, %v1927_v34  ;;  %v1531_v37 = vpop.permute.xlu1 %1530  ;;  %v1620_v56 = vpop.permute.xlu0 %1619 }
 0x3a1   :  { %v1534_v38 = vsel %vm1532_vm9, %v1529_v36, %v1531_v37  ;;  %1604 = vmatprep.mubr.f32.mxu0 %v1985_v5 }
 0x3a2   :  { %1570 = vmatprep.subr.mxu0 %v1534_v38 }
 0x3a3   :  { %1571 = vmatpush1.msra.mxu0 %v1533_v40 }
 0x3a4   :  { %1932 = vmatmul.mubr.msk.f32.vlgmr.msra.gmra.mxu0 %vm56_vm0, %v1931_v39  ;;  %v926_v41 = vpop.permute.xlu1 %925  ;;  %1794 = vmatprep.subr.mxu0 %v2137_v20 }
 0x3a5   :  { %v929_v42 = vsel %vm219_vm1, %v924_v13, %v926_v41  ;;  %v930_v43 = vsel %vm219_vm1, %v926_v41, %v928_v22  ;;  %1795 = vmatpush1.msra.mxu0 %v2146_v23  ;;  %1828 = vmatprep.mubr.f32.mxu0 %v1985_v5 }
 0x3a6   :  { %966 = vmatprep.subr.mxu1 %v930_v43 }
 0x3a7   :  { %967 = vmatpush1.msra.mxu1 %v929_v42 }
 0x3a8   :  { %1935 = vmatmul.mubr.msk.f32.vlgmr.msra.gmra.mxu0 %vm56_vm0, %v1754_v44  ;;  %v1086_v20 = vpop.permute.xlu1 %1085  ;;  %1919 = vmatmul.mubr.msk.f32.vlgmr.msra.gmra.mxu1 %vm56_vm0, %v1918_v45 }
 0x3a9   :  { %v1090_v46 = vsel %vm1089_vm10, %v1084_v15, %v1086_v20  ;;  %v1091_v23 = vsel %vm1089_vm10, %v1086_v20, %v1088_v26  ;;  %1161 = vmatprep.mubr.f32.mxu1 %v1985_v5 }
 0x3aa   :  { %1127 = vmatprep.subr.mxu1 %v1091_v23 }
 0x3ab   :  { %1128 = vmatpush1.msra.mxu1 %v1090_v46  ;;  %v1710_v46 = vld [vmem:[%s2320_s8] sm:$0xff] }
 0x3ac   :  { %v1263_v48 = vpop.permute.xlu1 %1262  ;;  %1922 = vmatmul.mubr.msk.f32.vlgmr.msra.gmra.mxu1 %vm56_vm0, %v1921_v47 }
 0x3ad   :  { %v1266_v49 = vsel %vm745_vm3, %v1261_v17, %v1263_v48  ;;  %v1267_v50 = vsel %vm745_vm3, %v1263_v48, %v1265_v18  ;;  %1337 = vmatprep.mubr.f32.mxu1 %v1985_v5  ;;  %v1706_v31 = vpop.permute.xlu0 %1705 }
 0x3ae   :  { %1303 = vmatprep.subr.mxu1 %v1267_v50 }
 0x3af   :  { %1304 = vmatpush1.msra.mxu1 %v1266_v49 }
 0x3b0   :  { %v1440_v52 = vpop.permute.xlu1 %1439  ;;  %1926 = vmatmul.mubr.msk.f32.vlgmr.msra.gmra.mxu1 %vm56_vm0, %v1925_v51 }
 0x3b1   :  { %v1444_v53 = vsel %vm1443_vm11, %v2232_v19, %v1440_v52  ;;  %v1445_v54 = vsel %vm1443_vm11, %v1440_v52, %v2234_v21  ;;  %1515 = vmatprep.mubr.f32.mxu1 %v1985_v5 }
 0x3b2   :  { %1481 = vmatprep.subr.mxu1 %v1445_v54 }
 0x3b3   :  { %1482 = vmatpush1.msra.mxu1 %v1444_v53 }
 0x3b4   :  { %v1618_v57 = vpop.permute.xlu1 %1617  ;;  %1930 = vmatmul.mubr.msk.f32.vlgmr.msra.gmra.mxu1 %vm56_vm0, %v1929_v55 }
 0x3b5   :  { %v1623_v58 = vsel %vm1621_vm12, %v1618_v57, %v1620_v56  ;;  %1693 = vmatprep.mubr.f32.mxu1 %v1985_v5 }
 0x3b6   :  { %1659 = vmatprep.subr.mxu1 %v1623_v58 }
 0x3b8   :  { %v1616_v59 = vpop.permute.xlu1 %1615 }
 0x3b9   :  { %v1622_v61 = vsel %vm1621_vm12, %v1616_v59, %v1618_v57 }
 0x3ba   :  { %1660 = vmatpush1.msra.mxu1 %v1622_v61 }
 0x3bb   :  { %1934 = vmatmul.mubr.msk.f32.vlgmr.msra.gmra.mxu1 %vm56_vm0, %v1933_v60 }
 0x3c5   :  { %v1759_v38 = vpop.permute.xlu1 %1758 }
 0x3d0   :  { %v1076_v62 = vpop.f32.mrf.mxu0 }
 0x3d2   :  { %v1078_v63 = vpop.f32.mrf.mxu0 }
 0x45c   :  { %v1251_v0 = vpop.f32.mrf.mxu0 }
 0x45e   :  { %v1253_v2 = vpop.f32.mrf.mxu0 }
 0x460   :  { %v1428_v5 = vpop.f32.mrf.mxu0 }
 0x462   :  { %v1430_v13 = vpop.f32.mrf.mxu0 }
 0x464   :  { %v1606_v21 = vpop.f32.mrf.mxu0 }
 0x466   :  { %v1608_v28 = vpop.f32.mrf.mxu0 }
 0x468   :  { %v1002_v1 = vpop.f32.mrf.mxu1  ;;  %v1830_v34 = vpop.f32.mrf.mxu0 }
 0x469   :  { %v1077_v3 = vadd.f32 %v1076_v62, %v1002_v1  ;;  %v1831_v39 = vadd.f32 %v1830_v34, %v1759_v38 }
 0x46a   :  { %v1004_v4 = vpop.f32.mrf.mxu1  ;;  %v1832_v42 = vpop.f32.mrf.mxu0 }
 0x46b   :  { %v1079_v6 = vadd.f32 %v1078_v63, %v1004_v4  ;;  %v1833_v44 = vadd.f32 %v1832_v42, %v1759_v38  ;;  %v1837_v45 = vmul.f32 %v1831_v39, %v2191_v24  ;;  %v1835_v4 = vld [vmem:[%s2324_s12] sm:$0xff] }
 0x46c   :  { %v1163_v7 = vpop.f32.mrf.mxu1 }
 0x46d   :  { %v1168_v8 = vadd.f32 %v1163_v7, %v1077_v3  ;;  %v1850_v20 = vmul.f32 %v1833_v44, %v2191_v24  ;;  %v1836_v3 = vld [vmem:[%s2325_s13] sm:$0xff] }
 0x46e   :  { %v1165_v9 = vpop.f32.mrf.mxu1 }
 0x46f   :  { %v1169_v10 = vadd.f32 %v1165_v9, %v1079_v6  ;;  %v1256_v11 = vadd.f32 %v1251_v0, %v1168_v8 }
 0x470   :  { %v1339_v12 = vpop.f32.mrf.mxu1 }
 0x471   :  { %v1344_v14 = vadd.f32 %v1339_v12, %v1256_v11  ;;  %v1257_v15 = vadd.f32 %v1253_v2, %v1169_v10  ;;  %v1711_v2 = vld [vmem:[%s2321_s9] sm:$0xff]  ;;  %s1995_s9 = smov [#allocation3]  }
 0x472   :  { %v1341_v16 = vpop.f32.mrf.mxu1  ;;  %s1893_s12 = sshll.u32 %s1995_s9, 4  ;;  %s1894_s12 = int_to_ptr.vmem [resolvable:$true] %s1893_s12 }
 0x473   :  { %v1345_v17 = vadd.f32 %v1341_v16, %v1257_v15  ;;  %v1433_v18 = vadd.f32 %v1428_v5, %v1344_v14  ;;  %s1962_s13 = scalar_lea.vmem %s1894_s12, 256  ;;  %p1967_p1 = scmp.lt.s32.totalorder %s1894_s12, %s1894_s12 }
 0x474   :  { %v1517_v19 = vpop.f32.mrf.mxu1  ;;  %p1963_p0 = scmp.ne.s32.totalorder %s1894_s12, %s1962_s13  ;;  %p1968_p2 = scmp.lt.s32.totalorder %s1962_s13, %s1962_s13 }
 0x475   :  { %v1434_v22 = vadd.f32 %v1430_v13, %v1345_v17  ;;  %v1522_v25 = vadd.f32 %v1517_v19, %v1433_v18 }
 0x476   :  { %v1519_v26 = vpop.f32.mrf.mxu1  ;;  %p1969_p3 = por %p1968_p2, %p1967_p1 }
 0x477   :  { %v1523_v27 = vadd.f32 %v1519_v26, %v1434_v22  ;;  %v1611_v29 = vadd.f32 %v1606_v21, %v1522_v25 }
 0x478   :  { %p1970_p4 = pnand %p1969_p3, %p1963_p0 }
 0x479   :  { %v1612_v33 = vadd.f32 %v1608_v28, %v1523_v27 }
 0x47b   :  { %v1695_v30 = vpop.f32.mrf.mxu1 }
 0x47c   :  { %v1700_v32 = vadd.f32 %v1695_v30, %v1611_v29 }
 0x47d   :  { %v1697_v35 = vpop.f32.mrf.mxu1 }
 0x47e   :  { %v1708_v36 = vadd.f32 %v1706_v31, %v1700_v32  ;;  %v1701_v37 = vadd.f32 %v1697_v35, %v1612_v33 }
 0x480   :  { %v1709_v40 = vadd.f32 %v1706_v31, %v1701_v37  ;;  %v1712_v41 = vmul.f32 %v1708_v36, %v2191_v24 }
 0x482   :  { %1713 = vadd.xlane.f32.xlu0 %v1712_v41  ;;  %v1725_v43 = vmul.f32 %v1709_v40, %v2191_v24 }
 0x484   :  { %1726 = vadd.xlane.f32.xlu1 %v1725_v43 }
 0x486   :  { %1838 = vadd.xlane.f32.xlu0 %v1837_v45 }
 0x48a   :  { %1851 = vadd.xlane.f32.xlu0 %v1850_v20 }
 0x495   :  { %1740 = vperm.xlu1 %1948, %v1710_v46  }
 0x50b   :  { %v1714_v23 = vpop.xlane.xlu0 %1713 }
 0x50c   :  { %v1715_v47 = vmul.f32 0.015625, %v1714_v23 }
 0x50d   :  { %v1727_v48 = vpop.xlane.xlu1 %1726 }
 0x50e   :  { %v1716_v51 = vsub.f32 %v1708_v36, %v1715_v47  ;;  %v1728_v52 = vmul.f32 0.015625, %v1727_v48 }
 0x50f   :  { %v1839_v49 = vpop.xlane.xlu0 %1838 }
 0x510   :  { %v1840_v50 = vmul.f32 0.015625, %v1839_v49  ;;  %v1729_v57 = vsub.f32 %v1709_v40, %v1728_v52  ;;  %v1717_v60 = vmul.f32 %v1716_v51, %v1716_v51 }
 0x511   :  { %v1741_v6 = vpop.permute.xlu1 %1740 }
 0x512   :  { %v1841_v53 = vsub.f32 %v1831_v39, %v1840_v50  ;;  %v1718_v62 = vmul.f32 %v1717_v60, %v2191_v24  ;;  %v1730_v0 = vmul.f32 %v1729_v57, %v1729_v57 }
 0x513   :  { %v1852_v54 = vpop.xlane.xlu0 %1851 }
 0x514   :  { %v1853_v55 = vmul.f32 0.015625, %v1852_v54  ;;  %v1842_v56 = vmul.f32 %v1841_v53, %v1841_v53  ;;  %v1731_v1 = vmul.f32 %v1730_v0, %v2191_v24 }
 0x516   :  { %v1854_v58 = vsub.f32 %v1833_v44, %v1853_v55  ;;  %v1843_v59 = vmul.f32 %v1842_v56, %v2191_v24 }
 0x518   :  { %1844 = vadd.xlane.f32.xlu1 %v1843_v59  ;;  %v1855_v61 = vmul.f32 %v1854_v58, %v1854_v58 }
 0x51a   :  { %v1856_v63 = vmul.f32 %v1855_v61, %v2191_v24 }
 0x51c   :  { %1719 = vadd.xlane.f32.xlu1 %v1718_v62  ;;  %1857 = vadd.xlane.f32.xlu0 %v1856_v63 }
 0x520   :  { %1732 = vadd.xlane.f32.xlu0 %v1731_v1 }
 0x52d   :  { %1747 = vperm.xlu1 %1948, %v1711_v2  }
 0x531   :  { %1872 = vperm.xlu1 %1948, %v1836_v3  }
 0x536   :  { %1865 = vperm.xlu0 %1949, %v1835_v4  }
 0x5a1   :  { %v1845_v7 = vpop.xlane.xlu1 %1844 }
 0x5a2   :  { %v1846_v5 = vmul.f32 0.015625, %v1845_v7 }
 0x5a4   :  { %v1847_v24 = vadd.f32 1e-05, %v1846_v5 }
 0x5a5   :  { %v1858_v8 = vpop.xlane.xlu0 %1857  ;;  %v1720_v9 = vpop.xlane.xlu1 %1719 }
 0x5a6   :  { %1954 = vrsqrt.f32 %v1847_v24  ;;  %v1859_v10 = vmul.f32 0.015625, %v1858_v8  ;;  %v1721_v11 = vmul.f32 0.015625, %v1720_v9 }
 0x5a8   :  { %v1860_v12 = vadd.f32 1e-05, %v1859_v10  ;;  %v1722_v13 = vadd.f32 1e-05, %v1721_v11 }
 0x5a9   :  { %v1733_v14 = vpop.xlane.xlu0 %1732  ;;  %v1748_v19 = vpop.permute.xlu1 %1747 }
 0x5aa   :  { %1956 = vrsqrt.f32 %v1860_v12  ;;  %v1734_v15 = vmul.f32 0.015625, %v1733_v14 }
 0x5ab   :  { %1958 = vrsqrt.f32 %v1722_v13 }
 0x5ac   :  { %v1735_v16 = vadd.f32 1e-05, %v1734_v15 }
 0x5ad   :  { %v1873_v32 = vpop.permute.xlu1 %1872 }
 0x5ae   :  { %1960 = vrsqrt.f32 %v1735_v16 }
 0x5b1   :  { %v1866_v26 = vpop.permute.xlu0 %1865 }
 0x5b3   :  { %v1955_v17 = vpop.eup %1954 }
 0x5b4   :  { %v1849_v18 = vmul.f32 %v1955_v17, %v1841_v53 }
 0x5b6   :  { %v1868_v28 = vmul.f32 %v1866_v26, %v1849_v18 }
 0x5b7   :  { %v1957_v21 = vpop.eup %1956 }
 0x5b8   :  { %v1959_v22 = vpop.eup %1958  ;;  %v1862_v25 = vmul.f32 %v1957_v21, %v1854_v58  ;;  %v1875_v35 = vadd.f32 %v1873_v32, %v1868_v28 }
 0x5b9   :  { %v1724_v27 = vmul.f32 %v1959_v22, %v1716_v51 }
 0x5ba   :  { %v1869_v33 = vmul.f32 %v1866_v26, %v1862_v25 }
 0x5bb   :  { %v1961_v29 = vpop.eup %1960  ;;  %v1743_v30 = vmul.f32 %v1741_v6, %v1724_v27 }
 0x5bc   :  { %v1737_v31 = vmul.f32 %v1961_v29, %v1729_v57  ;;  %v1876_v39 = vadd.f32 %v1873_v32, %v1869_v33 }
 0x5bd   :  { %v1750_v34 = vadd.f32 %v1748_v19, %v1743_v30 }
 0x5be   :  { %v1744_v36 = vmul.f32 %v1741_v6, %v1737_v31 }
 0x5bf   :  { %v1877_v37 = vadd.f32 %v1875_v35, %v1750_v34 }
 0x5c0   :  { %v1751_v38 = vadd.f32 %v1748_v19, %v1744_v36 }
 0x5c1   :  { %vm1879_vm13 = vcmp.ge.f32.partialorder %v1877_v37, 0.0  ;;  %v1881_v40 = vmul.f32 0.01, %v1877_v37 }
 0x5c2   :  { %v1878_v41 = vadd.f32 %v1876_v39, %v1751_v38 }
 0x5c3   :  { %v1883_v42 = vsel %vm1879_vm13, %v1877_v37, %v1881_v40 }
 0x5c4   :  { %vm1880_vm14 = vcmp.ge.f32.partialorder %v1878_v41, 0.0  ;;  %v1882_v43 = vmul.f32 0.01, %v1878_v41  ;;  %1885 = vst [vmem:[#allocation3] sm:$0xff] %v1883_v42 }
 0x5c6   :  { %v1884_v44 = vsel %vm1880_vm14, %v1878_v41, %v1882_v43 }
 0x5c7   :  { %1886 = vst [vmem:[#allocation3 + $0x8] sm:$0xff] %v1884_v44 }
 0x5c8   :  { %1973 = shalt.err (!%p1970_p4)
}
 0x5c9   :  { %1896 = dma.vmem_to_hbm [thread:$0]  %s1894_s12, 256, %s2326_s14, [#allocation4]  }
 0x5ca   :  { %1982 = dma.done.wait [#allocation4], 256  }
 0x5cb   :  { %1983 = vsyncadd [#allocation4], 4294967040 }
 0x5cc   :  { %1900 = vsyncpa [#allocation4], 1 }

</bundles_post_ra>
